<compile_context>
chip_gen: v7x
topology: tpu7x:2x2x1
jax: 0.10.0
libtpu: 0.0.40
codegen_flags: <defaults>
</compile_context>

<pallas_src>
import functools

import jax
import jax.numpy as jnp
from jax import lax
from jax.experimental import pallas as pl
from jax.experimental.pallas import tpu as pltpu

HIDDEN = 256


def _elu(x):
    """ELU(alpha=1), single-exp form. Negative branch = exp(x) - 1 in f32;
    accuracy loss vs expm1 near 0 is below the bf16 quantization applied to the
    activation before the next matmul."""
    xn = jnp.minimum(x, 0.0)          # argument <= 0, exp(xn) in (0, 1]
    em1 = jnp.exp(xn) - 1.0
    return jnp.where(x > 0.0, x, em1)


def critic_kernel(x_ref, w1_ref, b1_ref, w2_ref, b2_ref, w3_ref, b3_ref,
                  w4t_ref, b4_ref, o_ref):
    # x tile arrives in f32; cast to bf16 on the VPU for the MXU.
    xb = x_ref[...].astype(jnp.bfloat16)
    # Layer 1 (+ELU). norm_matrix already folded into w1. bf16 x bf16 -> f32 acc.
    h = jnp.dot(xb, w1_ref[...], preferred_element_type=jnp.float32) + b1_ref[...]
    h = _elu(h)
    # Layer 2 (+ELU)
    h = jnp.dot(h.astype(jnp.bfloat16), w2_ref[...],
                preferred_element_type=jnp.float32) + b2_ref[...]
    h = _elu(h)
    # Layer 3 (+ELU)
    h = jnp.dot(h.astype(jnp.bfloat16), w3_ref[...],
                preferred_element_type=jnp.float32) + b3_ref[...]
    h = _elu(h)
    # Output layer (outputSize == 1), lane-dense and transpose-free:
    #   contract (1, 256) with (block_b, 256) on the last dims -> (1, block_b)
    o = lax.dot_general(w4t_ref[...], h.astype(jnp.bfloat16),
                        dimension_numbers=(((1,), (1,)), ((), ())),
                        preferred_element_type=jnp.float32) + b4_ref[...]
    o_ref[...] = o.astype(o_ref.dtype)


def prepare_critic_params(params, norm_matrix):
    """One-time (offline) parameter transform for the kernel:
       fold norm_matrix into W1, cast weights to bf16 (f32 accumulation on the MXU),
       biases as f32 (1, H) rows, pre-transposed (1, 256) output weight."""
    (w1, b1), (w2, b2), (w3, b3), (w4, b4) = params
    out_size = w4.shape[1]
    if out_size != 1:
        # forward() does x.reshape(x.size(0)); only valid for outputSize == 1.
        raise ValueError(f"Critic.forward requires outputSize == 1, got {out_size}")
    # NOTE: x and norm-folded W1 are quantized to bf16 before the first matmul;
    # inputs with large dynamic range deviate from f32 torch more than hidden layers.
    w1n = (norm_matrix.astype(jnp.float32)[:, None] * w1).astype(jnp.bfloat16)
    return {
        "w1": w1n,
        "b1": b1.reshape(1, HIDDEN).astype(jnp.float32),
        "w2": w2.astype(jnp.bfloat16),
        "b2": b2.reshape(1, HIDDEN).astype(jnp.float32),
        "w3": w3.astype(jnp.bfloat16),
        "b3": b3.reshape(1, HIDDEN).astype(jnp.float32),
        "w4t": w4.T.astype(jnp.bfloat16),                 # (1, 256)
        "b4": b4.reshape(1, 1).astype(jnp.float32),
    }


def _round_up(n, m):
    return -(-n // m) * m


def _default_block_b(batch):
    """128 for small batches; otherwise up to 512 rows/step, preferring >= 2 grid
    steps so v7x's two TensorCores both get work (batch axis is 'parallel')."""
    if batch <= 128:
        return 128
    half = _round_up(-(-batch // 2), 128)   # ceil(B/2) rounded up to 128
    return min(512, half)


@functools.partial(jax.jit, static_argnames=("block_b",))
def critic_forward(x, prepared, *, block_b=None):
    """x: (B, inputSize) f32 -> (B,) f32 (== torch forward().reshape(B))."""
    w1, b1 = prepared["w1"], prepared["b1"]
    w2, b2 = prepared["w2"], prepared["b2"]
    w3, b3 = prepared["w3"], prepared["b3"]
    w4t, b4 = prepared["w4t"], prepared["b4"]

    B, in_size = x.shape
    if block_b is None:
        block_b = _default_block_b(B)
    grid_b = pl.cdiv(B, block_b)
    bp = grid_b * block_b

    xp = x if bp == B else jnp.pad(x, ((0, bp - B), (0, 0)))  # pad batch to tile multiple

    flops = 2 * bp * (in_size * HIDDEN + 2 * HIDDEN * HIDDEN + HIDDEN)
    transcendentals = 3 * bp * HIDDEN            # one exp per hidden activation
    bytes_accessed = (
        bp * in_size * 4                          # x DMA'd in f32
        + sum(a.size * a.dtype.itemsize for a in (w1, b1, w2, b2, w3, b3, w4t, b4))
        + bp * 4)

    out = pl.pallas_call(
        critic_kernel,
        out_shape=jax.ShapeDtypeStruct((grid_b, block_b), jnp.float32),
        grid=(grid_b,),
        in_specs=[
            pl.BlockSpec((block_b, in_size), lambda i: (i, 0)),   # x: streamed per step
            pl.BlockSpec(w1.shape, lambda i: (0, 0)),             # weights: VMEM-resident
            pl.BlockSpec(b1.shape, lambda i: (0, 0)),
            pl.BlockSpec(w2.shape, lambda i: (0, 0)),
            pl.BlockSpec(b2.shape, lambda i: (0, 0)),
            pl.BlockSpec(w3.shape, lambda i: (0, 0)),
            pl.BlockSpec(b3.shape, lambda i: (0, 0)),
            pl.BlockSpec(w4t.shape, lambda i: (0, 0)),
            pl.BlockSpec(b4.shape, lambda i: (0, 0)),
        ],
        out_specs=pl.BlockSpec((1, block_b), lambda i: (i, 0)),    # lane-dense output rows
        compiler_params=pltpu.CompilerParams(
            dimension_semantics=("parallel",)),
        cost_estimate=pl.CostEstimate(
            flops=int(flops),
            transcendentals=int(transcendentals),
            bytes_accessed=int(bytes_accessed)),
    )(xp, w1, b1, w2, b2, w3, b3, w4t, b4)

    return out.reshape(-1)[:B]


def init_critic_params(key, input_size, output_size):
    """Deterministic xavier_uniform weights, zero biases; last layer weight *= 1e-4."""
    dims = [(input_size, HIDDEN), (HIDDEN, HIDDEN), (HIDDEN, HIDDEN), (HIDDEN, output_size)]
    params = []
    keys = jax.random.split(key, len(dims))
    for i, ((fan_in, fan_out), k) in enumerate(zip(dims, keys)):
        bound = (6.0 / (fan_in + fan_out)) ** 0.5
        w = jax.random.uniform(k, (fan_in, fan_out), jnp.float32, -bound, bound)
        if i == len(dims) - 1:
            w = w * 1e-4  # mirrors: self.layers['6'].weight.data *= 0.0001
        b = jnp.zeros((fan_out,), jnp.float32)
        params.append((w, b))
    return params


if __name__ == "__main__":
    B = 8
    INPUT_SIZE = 32
    OUTPUT_SIZE = 1  # forward's reshape(x.size(0)) implies outputSize == 1

    key = jax.random.PRNGKey(0)
    k_x, k_p = jax.random.split(key)
    x = jax.random.normal(k_x, (B, INPUT_SIZE), jnp.float32)
    norm_matrix = jnp.ones((INPUT_SIZE,), jnp.float32)
    params = init_critic_params(k_p, INPUT_SIZE, OUTPUT_SIZE)
    prepared = prepare_critic_params(params, norm_matrix)

    y = critic_forward(x, prepared)
    jax.block_until_ready(y)
    assert y.shape == (B,)

    # Reference 1: mirrors the kernel's bf16/f32 mixed precision exactly.
    def ref_bf16(x):
        p = prepared
        h = jnp.dot(x.astype(jnp.bfloat16), p["w1"],
                    preferred_element_type=jnp.float32) + p["b1"]
        h = _elu(h)
        h = jnp.dot(h.astype(jnp.bfloat16), p["w2"],
                    preferred_element_type=jnp.float32) + p["b2"]
        h = _elu(h)
        h = jnp.dot(h.astype(jnp.bfloat16), p["w3"],
                    preferred_element_type=jnp.float32) + p["b3"]
        h = _elu(h)
        o = jnp.dot(h.astype(jnp.bfloat16), p["w4t"].T,
                    preferred_element_type=jnp.float32) + p["b4"]
        return o.reshape(x.shape[0])

    # Reference 2: full-f32 PyTorch-equivalent forward (expm1-based ELU).
    def ref_f32(x):
        h = x * norm_matrix
        for i, (w, b) in enumerate(params):
            h = h @ w + b
            if i < 3:
                h = jnp.where(h > 0, h, jnp.expm1(h))
        return h.reshape(x.shape[0])

    y_bf16 = ref_bf16(x)
    y_f32 = ref_f32(x)
    # Kernel matches a same-precision reference tightly ...
    assert jnp.allclose(y, y_bf16, rtol=2e-2, atol=1e-6), (y, y_bf16)
    # ... and the full-precision PyTorch semantics within bf16 quantization error.
    assert jnp.allclose(y, y_f32, rtol=5e-2, atol=2e-5), (y, y_f32)
    print("KERNEL_OK")
</pallas_src>

<mosaic_0001>
module attributes {stable_mosaic.version = 11 : i64} {
  func.func @critic_kernel(%arg0: i32, %arg1: memref<128x32xf32, #tpu.memory_space<vmem>>, %arg2: memref<32x256xbf16, #tpu.memory_space<vmem>>, %arg3: memref<1x256xf32, #tpu.memory_space<vmem>>, %arg4: memref<256x256xbf16, #tpu.memory_space<vmem>>, %arg5: memref<1x256xf32, #tpu.memory_space<vmem>>, %arg6: memref<256x256xbf16, #tpu.memory_space<vmem>>, %arg7: memref<1x256xf32, #tpu.memory_space<vmem>>, %arg8: memref<1x256xbf16, #tpu.memory_space<vmem>>, %arg9: memref<1x1xf32, #tpu.memory_space<vmem>>, %arg10: memref<1x128xf32, #tpu.memory_space<vmem>>) attributes {dimension_semantics = [#tpu.dimension_semantics<parallel>], iteration_bounds = array<i64: 1>, scalar_prefetch = 0 : i64, scratch_operands = 0 : i64, tpu.core_type = #tpu.core_type<tc>, window_params = [{transform_indices = @transform_0, window_bounds = array<i64: 128, 32>}, {pipeline_mode = #tpu.pipeline_mode<synchronous>, transform_indices = @transform_1, window_bounds = array<i64: 32, 256>}, {pipeline_mode = #tpu.pipeline_mode<synchronous>, transform_indices = @transform_2, window_bounds = array<i64: 1, 256>}, {pipeline_mode = #tpu.pipeline_mode<synchronous>, transform_indices = @transform_3, window_bounds = array<i64: 256, 256>}, {pipeline_mode = #tpu.pipeline_mode<synchronous>, transform_indices = @transform_4, window_bounds = array<i64: 1, 256>}, {pipeline_mode = #tpu.pipeline_mode<synchronous>, transform_indices = @transform_5, window_bounds = array<i64: 256, 256>}, {pipeline_mode = #tpu.pipeline_mode<synchronous>, transform_indices = @transform_6, window_bounds = array<i64: 1, 256>}, {pipeline_mode = #tpu.pipeline_mode<synchronous>, transform_indices = @transform_7, window_bounds = array<i64: 1, 256>}, {pipeline_mode = #tpu.pipeline_mode<synchronous>, transform_indices = @transform_8, window_bounds = array<i64: 1, 1>}, {transform_indices = @transform_9, window_bounds = array<i64: 1, 128>}]} {
    %c0 = arith.constant 0 : index
    %c0_0 = arith.constant 0 : index
    %0 = vector.load %arg1[%c0, %c0_0] : memref<128x32xf32, #tpu.memory_space<vmem>>, vector<128x32xf32>
    %1 = arith.truncf %0 : vector<128x32xf32> to vector<128x32xbf16>
    %c0_1 = arith.constant 0 : index
    %c0_2 = arith.constant 0 : index
    %2 = vector.load %arg2[%c0_1, %c0_2] : memref<32x256xbf16, #tpu.memory_space<vmem>>, vector<32x256xbf16>
    %cst = arith.constant dense<0.000000e+00> : vector<128x256xf32>
    %3 = tpu.matmul %1, %2, %cst {dimension_numbers = #tpu.dot_dimension_numbers<[1], [0], [0], [1], [0, 0, 1, 1], [], []>} : vector<128x32xbf16>, vector<32x256xbf16>, vector<128x256xf32> -> vector<128x256xf32>
    %c0_3 = arith.constant 0 : index
    %c0_4 = arith.constant 0 : index
    %4 = vector.load %arg3[%c0_3, %c0_4] : memref<1x256xf32, #tpu.memory_space<vmem>>, vector<1x256xf32>
    %5 = vector.broadcast %4 : vector<1x256xf32> to vector<128x256xf32>
    %6 = arith.addf %3, %5 : vector<128x256xf32>
    %cst_5 = arith.constant 0.000000e+00 : f32
    %7 = vector.broadcast %cst_5 : f32 to vector<128x256xf32>
    %8 = arith.minimumf %6, %7 : vector<128x256xf32>
    %9 = math.exp %8 : vector<128x256xf32>
    %cst_6 = arith.constant 1.000000e+00 : f32
    %10 = vector.broadcast %cst_6 : f32 to vector<128x256xf32>
    %11 = arith.subf %9, %10 : vector<128x256xf32>
    %cst_7 = arith.constant 0.000000e+00 : f32
    %12 = vector.broadcast %cst_7 : f32 to vector<128x256xf32>
    %13 = arith.cmpf ogt, %6, %12 : vector<128x256xf32>
    %14 = arith.select %13, %6, %11 : vector<128x256xi1>, vector<128x256xf32>
    %15 = arith.truncf %14 : vector<128x256xf32> to vector<128x256xbf16>
    %c0_8 = arith.constant 0 : index
    %c0_9 = arith.constant 0 : index
    %16 = vector.load %arg4[%c0_8, %c0_9] : memref<256x256xbf16, #tpu.memory_space<vmem>>, vector<256x256xbf16>
    %cst_10 = arith.constant dense<0.000000e+00> : vector<128x256xf32>
    %17 = tpu.matmul %15, %16, %cst_10 {dimension_numbers = #tpu.dot_dimension_numbers<[1], [0], [0], [1], [0, 0, 1, 1], [], []>} : vector<128x256xbf16>, vector<256x256xbf16>, vector<128x256xf32> -> vector<128x256xf32>
    %c0_11 = arith.constant 0 : index
    %c0_12 = arith.constant 0 : index
    %18 = vector.load %arg5[%c0_11, %c0_12] : memref<1x256xf32, #tpu.memory_space<vmem>>, vector<1x256xf32>
    %19 = vector.broadcast %18 : vector<1x256xf32> to vector<128x256xf32>
    %20 = arith.addf %17, %19 : vector<128x256xf32>
    %cst_13 = arith.constant 0.000000e+00 : f32
    %21 = vector.broadcast %cst_13 : f32 to vector<128x256xf32>
    %22 = arith.minimumf %20, %21 : vector<128x256xf32>
    %23 = math.exp %22 : vector<128x256xf32>
    %cst_14 = arith.constant 1.000000e+00 : f32
    %24 = vector.broadcast %cst_14 : f32 to vector<128x256xf32>
    %25 = arith.subf %23, %24 : vector<128x256xf32>
    %cst_15 = arith.constant 0.000000e+00 : f32
    %26 = vector.broadcast %cst_15 : f32 to vector<128x256xf32>
    %27 = arith.cmpf ogt, %20, %26 : vector<128x256xf32>
    %28 = arith.select %27, %20, %25 : vector<128x256xi1>, vector<128x256xf32>
    %29 = arith.truncf %28 : vector<128x256xf32> to vector<128x256xbf16>
    %c0_16 = arith.constant 0 : index
    %c0_17 = arith.constant 0 : index
    %30 = vector.load %arg6[%c0_16, %c0_17] : memref<256x256xbf16, #tpu.memory_space<vmem>>, vector<256x256xbf16>
    %cst_18 = arith.constant dense<0.000000e+00> : vector<128x256xf32>
    %31 = tpu.matmul %29, %30, %cst_18 {dimension_numbers = #tpu.dot_dimension_numbers<[1], [0], [0], [1], [0, 0, 1, 1], [], []>} : vector<128x256xbf16>, vector<256x256xbf16>, vector<128x256xf32> -> vector<128x256xf32>
    %c0_19 = arith.constant 0 : index
    %c0_20 = arith.constant 0 : index
    %32 = vector.load %arg7[%c0_19, %c0_20] : memref<1x256xf32, #tpu.memory_space<vmem>>, vector<1x256xf32>
    %33 = vector.broadcast %32 : vector<1x256xf32> to vector<128x256xf32>
    %34 = arith.addf %31, %33 : vector<128x256xf32>
    %cst_21 = arith.constant 0.000000e+00 : f32
    %35 = vector.broadcast %cst_21 : f32 to vector<128x256xf32>
    %36 = arith.minimumf %34, %35 : vector<128x256xf32>
    %37 = math.exp %36 : vector<128x256xf32>
    %cst_22 = arith.constant 1.000000e+00 : f32
    %38 = vector.broadcast %cst_22 : f32 to vector<128x256xf32>
    %39 = arith.subf %37, %38 : vector<128x256xf32>
    %cst_23 = arith.constant 0.000000e+00 : f32
    %40 = vector.broadcast %cst_23 : f32 to vector<128x256xf32>
    %41 = arith.cmpf ogt, %34, %40 : vector<128x256xf32>
    %42 = arith.select %41, %34, %39 : vector<128x256xi1>, vector<128x256xf32>
    %c0_24 = arith.constant 0 : index
    %c0_25 = arith.constant 0 : index
    %43 = vector.load %arg8[%c0_24, %c0_25] : memref<1x256xbf16, #tpu.memory_space<vmem>>, vector<1x256xbf16>
    %44 = arith.truncf %42 : vector<128x256xf32> to vector<128x256xbf16>
    %cst_26 = arith.constant dense<0.000000e+00> : vector<1x128xf32>
    %45 = tpu.matmul %43, %44, %cst_26 {dimension_numbers = #tpu.dot_dimension_numbers<[1], [1], [0], [0], [0, 0, 1, 0], [], []>} : vector<1x256xbf16>, vector<128x256xbf16>, vector<1x128xf32> -> vector<1x128xf32>
    %c0_27 = arith.constant 0 : index
    %c0_28 = arith.constant 0 : index
    %46 = vector.load %arg9[%c0_27, %c0_28] : memref<1x1xf32, #tpu.memory_space<vmem>>, vector<1x1xf32>
    %47 = vector.broadcast %46 : vector<1x1xf32> to vector<1x128xf32>
    %48 = arith.addf %45, %47 : vector<1x128xf32>
    %c0_29 = arith.constant 0 : index
    %c0_30 = arith.constant 0 : index
    %49 = vector.load %arg10[%c0_29, %c0_30] : memref<1x128xf32, #tpu.memory_space<vmem>>, vector<1x128xf32>
    tpu.vector_store %arg10[%c0_29, %c0_30], %48 {strides = array<i32>} : memref<1x128xf32, #tpu.memory_space<vmem>>, vector<1x128xf32>,
    return
  }
  func.func @transform_0(%arg0: i32) -> (i32, i32) {
    %c0_i32 = arith.constant 0 : i32
    %c0_i32_0 = arith.constant 0 : i32
    return %arg0, %c0_i32 : i32, i32
  }
  func.func @transform_1(%arg0: i32) -> (i32, i32) {
    %c0_i32 = arith.constant 0 : i32
    %c0_i32_0 = arith.constant 0 : i32
    %c0_i32_1 = arith.constant 0 : i32
    return %c0_i32, %c0_i32_0 : i32, i32
  }
  func.func @transform_2(%arg0: i32) -> (i32, i32) {
    %c0_i32 = arith.constant 0 : i32
    %c0_i32_0 = arith.constant 0 : i32
    %c0_i32_1 = arith.constant 0 : i32
    return %c0_i32, %c0_i32_0 : i32, i32
  }
  func.func @transform_3(%arg0: i32) -> (i32, i32) {
    %c0_i32 = arith.constant 0 : i32
    %c0_i32_0 = arith.constant 0 : i32
    %c0_i32_1 = arith.constant 0 : i32
    return %c0_i32, %c0_i32_0 : i32, i32
  }
  func.func @transform_4(%arg0: i32) -> (i32, i32) {
    %c0_i32 = arith.constant 0 : i32
    %c0_i32_0 = arith.constant 0 : i32
    %c0_i32_1 = arith.constant 0 : i32
    return %c0_i32, %c0_i32_0 : i32, i32
  }
  func.func @transform_5(%arg0: i32) -> (i32, i32) {
    %c0_i32 = arith.constant 0 : i32
    %c0_i32_0 = arith.constant 0 : i32
    %c0_i32_1 = arith.constant 0 : i32
    return %c0_i32, %c0_i32_0 : i32, i32
  }
  func.func @transform_6(%arg0: i32) -> (i32, i32) {
    %c0_i32 = arith.constant 0 : i32
    %c0_i32_0 = arith.constant 0 : i32
    %c0_i32_1 = arith.constant 0 : i32
    return %c0_i32, %c0_i32_0 : i32, i32
  }
  func.func @transform_7(%arg0: i32) -> (i32, i32) {
    %c0_i32 = arith.constant 0 : i32
    %c0_i32_0 = arith.constant 0 : i32
    %c0_i32_1 = arith.constant 0 : i32
    return %c0_i32, %c0_i32_0 : i32, i32
  }
  func.func @transform_8(%arg0: i32) -> (i32, i32) {
    %c0_i32 = arith.constant 0 : i32
    %c0_i32_0 = arith.constant 0 : i32
    %c0_i32_1 = arith.constant 0 : i32
    return %c0_i32, %c0_i32_0 : i32, i32
  }
  func.func @transform_9(%arg0: i32) -> (i32, i32) {
    %c0_i32 = arith.constant 0 : i32
    %c0_i32_0 = arith.constant 0 : i32
    return %arg0, %c0_i32 : i32, i32
  }
}

</mosaic_0001>

<bundles_post_ra>
// kernel: critic_forward.1
= control target key start
LH: loop header
LB: loop body
LE: loop exit
PB: predicated region body
PF: predicated region fallthrough
CT: control target
= control target key end

     0   :  { %s2916_s0 = inlined_call_operand.vmem [shape: f32[128,32], index: 0, kind: input, shape index: {}]   ;;  %s2917_s1 = inlined_call_operand.vmem [shape: bf16[32,256], index: 1, kind: input, shape index: {}]   ;;  %s2918_s2 = inlined_call_operand.vmem [shape: f32[1,256], index: 2, kind: input, shape index: {}]   ;;  %s2919_s3 = inlined_call_operand.hbm [shape: bf16[256,256], index: 3, kind: input, shape index: {}]   ;;  %s2920_s4 = inlined_call_operand.vmem [shape: f32[1,256], index: 4, kind: input, shape index: {}]   ;;  %s2921_s5 = inlined_call_operand.hbm [shape: bf16[256,256], index: 5, kind: input, shape index: {}]   ;;  %s2922_s6 = inlined_call_operand.vmem [shape: f32[1,256], index: 6, kind: input, shape index: {}]   ;;  %s2923_s7 = inlined_call_operand.vmem [shape: bf16[1,256], index: 7, kind: input, shape index: {}]   ;;  %s2924_s8 = inlined_call_operand.<no memory space> [shape: f32[1,1], index: 8, kind: input, shape index: {}]   ;;  %s2925_s9 = inlined_call_operand.vmem [shape: f32[1,128], index: 9, kind: output, shape index: {}]  }
   0x1   :  { %v14_v0 = vstv %s2924_s8 }
   0x2   :  { %15 = vst [vmem:[#allocation2] sm:$0x1] %v14_v0 }
   0x3   :  { %16 = vsyncpa [#allocation4], 0 }
   0x4   :  { %17 = vsyncpa [#allocation6], 0  ;;  %s2124_s11 = smov [#allocation3]   ;;  %s2076_s15 = scalar_lea.hbm %s2919_s3, 4096 }
   0x5   :  { %s29_s12 = sshll.u32 %s2124_s11, 4  ;;  %p2077_p0 = scmp.ne.s32.totalorder %s2919_s3, %s2076_s15  ;;  %s30_s12 = int_to_ptr.vmem [resolvable:$true] %s29_s12 }
   0x6   :  { %p2080_p1 = scmp.lt.u32.totalorder %s2076_s15, %s2919_s3 }
   0x8   :  { %p2082_p2 = pnand %p2080_p1, %p2077_p0 }
   0xa   :  { %2085 = shalt.err (!%p2082_p2)
}
   0xb   :  { %s2086_s8 = scalar_lea.vmem %s30_s12, 4096  ;;  %p2091_p4 = scmp.lt.s32.totalorder %s30_s12, %s30_s12 }
   0xc   :  { %p2087_p3 = scmp.ne.s32.totalorder %s30_s12, %s2086_s8  ;;  %p2092_p5 = scmp.lt.s32.totalorder %s2086_s8, %s2086_s8 }
   0xe   :  { %p2093_p6 = por %p2092_p5, %p2091_p4 }
  0x10   :  { %p2094_p7 = pnand %p2093_p6, %p2087_p3 }
  0x12   :  { %2097 = shalt.err (!%p2094_p7)
}
  0x13   :  { %s2125_s20 = smov 128   ;;  %s2126_s21 = smov 8  }
  0x14   :  { %35 = dma.hbm_to_vmem [thread:$0]  %s2919_s3, 4096, %s30_s12, [#allocation4], %s2125_s20, %s2125_s20, %s2126_s21  }
  0x15   :  { %s2127_s24 = smov [#allocation5]   ;;  %s2098_s28 = scalar_lea.hbm %s2921_s5, 4096 }
  0x16   :  { %s43_s25 = sshll.u32 %s2127_s24, 4  ;;  %p2099_p8 = scmp.ne.s32.totalorder %s2921_s5, %s2098_s28  ;;  %s44_s25 = int_to_ptr.vmem [resolvable:$true] %s43_s25 }
  0x17   :  { %p2102_p9 = scmp.lt.u32.totalorder %s2098_s28, %s2921_s5 }
  0x19   :  { %p2104_p10 = pnand %p2102_p9, %p2099_p8 }
  0x1b   :  { %2107 = shalt.err (!%p2104_p10)
}
  0x1c   :  { %s2108_s13 = scalar_lea.vmem %s44_s25, 4096  ;;  %p2113_p12 = scmp.lt.s32.totalorder %s44_s25, %s44_s25 }
  0x1d   :  { %p2109_p11 = scmp.ne.s32.totalorder %s44_s25, %s2108_s13  ;;  %p2114_p13 = scmp.lt.s32.totalorder %s2108_s13, %s2108_s13 }
  0x1f   :  { %p2115_p0 = por %p2114_p13, %p2113_p12 }
  0x21   :  { %p2116_p1 = pnand %p2115_p0, %p2109_p11 }
  0x23   :  { %2119 = shalt.err (!%p2116_p1)
}
  0x24   :  { %49 = dma.hbm_to_vmem [thread:$0]  %s2921_s5, 4096, %s44_s25, [#allocation6], %s2125_s20, %s2125_s20, %s2126_s21  }
  0x25   :  { %2120 = dma.done.wait [#allocation4], 4096  }
  0x26   :  { %2121 = vsyncadd [#allocation4], 4294963200 }
  0x27   :  { %2122 = dma.done.wait [#allocation6], 4096  }
  0x28   :  { %2123 = vsyncadd [#allocation6], 4294963200  ;;  %v2128_v1 = vmov 0   ;;  %v1782_v2 = vld [vmem:[%s2917_s1 + $0x4] ss:$8 sps:$4 sm:$0xff]   ;;  %vm123_vm0 = vcmask 261120  }
  0x29   :  { %180 = vmatprep.mubr.bf16.mxu0 %v2128_v1  ;;  %1781 = vset.pattern.permute.xlu0 %v2128_v1  ;;  %v1784_v3 = vld [vmem:[%s2917_s1] ss:$8 sps:$4 sm:$0xff]   ;;  %v1785_v4 = vld [vmem:[%s2917_s1 + $0x14] ss:$8 sps:$4 sm:$0xff]   ;;  %v1787_v5 = vld [vmem:[%s2917_s1 + $0x10] ss:$8 sps:$4 sm:$0xff]  }
  0x2a   :  { %148 = vmatprep.subr.bf16.mxu0 %v1782_v2  ;;  %v63_v6 = vld [vmem:[%s2916_s0] sm:$0xff]  ;;  %v64_v7 = vld [vmem:[%s2916_s0 + $0x8] sm:$0xff]  ;;  %v65_v11 = vld [vmem:[%s2916_s0 + $0x10] sm:$0xff] }
  0x2b   :  { %149 = vmatpush1.bf16.msra.mxu0 %v1784_v3  ;;  %v79_v8 = vpack.c.bf16 %v64_v7, %v63_v6  ;;  %v1788_v9 = vld [vmem:[#allocation3 + $0x4] ss:$8 sps:$4 sm:$0xff]   ;;  %v1790_v10 = vld [vmem:[#allocation3] ss:$8 sps:$4 sm:$0xff]   ;;  %v1791_v12 = vld [vmem:[#allocation3 + $0x14] ss:$8 sps:$4 sm:$0xff]  }
  0x2c   :  { %150 = vmatprep.subr.bf16.mxu0 %v1785_v4  ;;  %673 = vmatprep.subr.bf16.mxu1 %v1788_v9  ;;  %v66_v13 = vld [vmem:[%s2916_s0 + $0x18] sm:$0xff]  ;;  %v1794_v15 = vld [vmem:[#allocation3 + $0x24] ss:$8 sps:$4 sm:$0xff]   ;;  %v1796_v17 = vld [vmem:[#allocation3 + $0x20] ss:$8 sps:$4 sm:$0xff]  }
  0x2d   :  { %674 = vmatpush1.bf16.msra.mxu1 %v1790_v10  ;;  %v1793_v14 = vld [vmem:[#allocation3 + $0x10] ss:$8 sps:$4 sm:$0xff]   ;;  %v80_v16 = vpack.c.bf16 %v66_v13, %v65_v11  ;;  %v1797_v18 = vld [vmem:[#allocation3 + $0x34] ss:$8 sps:$4 sm:$0xff]   ;;  %v68_v20 = vld [vmem:[%s2916_s0 + $0x28] sm:$0xff] }
  0x2e   :  { %675 = vmatprep.subr.bf16.mxu1 %v1791_v12  ;;  %v67_v19 = vld [vmem:[%s2916_s0 + $0x20] sm:$0xff]  ;;  %v1799_v21 = vld [vmem:[#allocation3 + $0x30] ss:$8 sps:$4 sm:$0xff]   ;;  %v72_v34 = vld [vmem:[%s2916_s0 + $0x48] sm:$0xff] }
  0x2f   :  { %151 = vmatpush1.bf16.msra.mxu0 %v1787_v5  ;;  %v1800_v22 = vld [vmem:[#allocation3 + $0x44] ss:$8 sps:$4 sm:$0xff]   ;;  %v1802_v23 = vld [vmem:[#allocation3 + $0x40] ss:$8 sps:$4 sm:$0xff]   ;;  %v81_v24 = vpack.c.bf16 %v68_v20, %v67_v19  ;;  %v1803_v25 = vld [vmem:[#allocation3 + $0x54] ss:$8 sps:$4 sm:$0xff]  }
  0x30   :  { %v69_v26 = vld [vmem:[%s2916_s0 + $0x30] sm:$0xff]  ;;  %v70_v27 = vld [vmem:[%s2916_s0 + $0x38] sm:$0xff]  ;;  %v1808_v30 = vld [vmem:[#allocation3 + $0x60] ss:$8 sps:$4 sm:$0xff]  }
  0x31   :  { %676 = vmatpush1.bf16.msra.mxu1 %v1793_v14  ;;  %v1805_v28 = vld [vmem:[#allocation3 + $0x50] ss:$8 sps:$4 sm:$0xff]   ;;  %v1806_v29 = vld [vmem:[#allocation3 + $0x64] ss:$8 sps:$4 sm:$0xff]   ;;  %v82_v31 = vpack.c.bf16 %v70_v27, %v69_v26  ;;  %v1809_v32 = vld [vmem:[#allocation3 + $0x74] ss:$8 sps:$4 sm:$0xff]  }
  0x32   :  { %1606 = vmatmul.mubr.msk.bf16.vlgmr.msra.gmra.mrb[0].mxu0 %vm123_vm0, %v79_v8  ;;  %677 = vmatprep.subr.bf16.mxu1 %v1794_v15  ;;  %v71_v33 = vld [vmem:[%s2916_s0 + $0x40] sm:$0xff]  ;;  %v1811_v35 = vld [vmem:[#allocation3 + $0x70] ss:$8 sps:$4 sm:$0xff]   ;;  %v76_v44 = vld [vmem:[%s2916_s0 + $0x68] sm:$0xff]  ;;  %v93_v15 = vlaneseq }
  0x33   :  { %190 = vmatprep.mubr.bf16.mxu0 %v2128_v1  ;;  %v1812_v36 = vld [vmem:[#allocation3 + $0x84] ss:$8 sps:$4 sm:$0xff]   ;;  %v83_v37 = vpack.c.bf16 %v72_v34, %v71_v33  ;;  %v1814_v38 = vld [vmem:[#allocation3 + $0x80] ss:$8 sps:$4 sm:$0xff]   ;;  %v1815_v39 = vld [vmem:[#allocation3 + $0x94] ss:$8 sps:$4 sm:$0xff]  }
  0x34   :  { %v73_v40 = vld [vmem:[%s2916_s0 + $0x50] sm:$0xff]  ;;  %v74_v41 = vld [vmem:[%s2916_s0 + $0x58] sm:$0xff]  ;;  %v75_v43 = vld [vmem:[%s2916_s0 + $0x60] sm:$0xff] }
  0x35   :  { %678 = vmatpush1.bf16.msra.mxu1 %v1796_v17  ;;  %v84_v42 = vpack.c.bf16 %v74_v41, %v73_v40  ;;  %v85_v45 = vpack.c.bf16 %v76_v44, %v75_v43  ;;  %v77_v46 = vld [vmem:[%s2916_s0 + $0x70] sm:$0xff]  ;;  %v78_v47 = vld [vmem:[%s2916_s0 + $0x78] sm:$0xff]  ;;  %v1820_v51 = vld [vmem:[#allocation3 + $0xa0] ss:$8 sps:$4 sm:$0xff]  }
  0x36   :  { %679 = vmatprep.subr.bf16.mxu1 %v1797_v18  ;;  %v86_v48 = vpack.c.bf16 %v78_v47, %v77_v46  ;;  %v1817_v49 = vld [vmem:[#allocation3 + $0x90] ss:$8 sps:$4 sm:$0xff]   ;;  %v1818_v50 = vld [vmem:[#allocation3 + $0xa4] ss:$8 sps:$4 sm:$0xff]   ;;  %v1821_v52 = vld [vmem:[#allocation3 + $0xb4] ss:$8 sps:$4 sm:$0xff]  }
  0x37   :  { %v1823_v53 = vld [vmem:[#allocation3 + $0xb0] ss:$8 sps:$4 sm:$0xff]   ;;  %v1824_v54 = vld [vmem:[#allocation3 + $0xc4] ss:$8 sps:$4 sm:$0xff]   ;;  %v1826_v55 = vld [vmem:[#allocation3 + $0xc0] ss:$8 sps:$4 sm:$0xff]  }
  0x38   :  { %v1827_v56 = vld [vmem:[#allocation3 + $0xd4] ss:$8 sps:$4 sm:$0xff]   ;;  %v1829_v57 = vld [vmem:[#allocation3 + $0xd0] ss:$8 sps:$4 sm:$0xff]   ;;  %v1830_v58 = vld [vmem:[#allocation3 + $0xe4] ss:$8 sps:$4 sm:$0xff]  }
  0x39   :  { %680 = vmatpush1.bf16.msra.mxu1 %v1799_v21  ;;  %v1832_v59 = vld [vmem:[#allocation3 + $0xe0] ss:$8 sps:$4 sm:$0xff]   ;;  %v1833_v60 = vld [vmem:[#allocation3 + $0xf4] ss:$8 sps:$4 sm:$0xff]   ;;  %v1835_v61 = vld [vmem:[#allocation3 + $0xf0] ss:$8 sps:$4 sm:$0xff]  }
  0x3a   :  { %1607 = vmatmul.mubr.msk.bf16.gmra.mrb[4].mxu0 %vm123_vm0, %v80_v16  ;;  %681 = vmatprep.subr.bf16.mxu1 %v1800_v22  ;;  %v1836_v62 = vld [vmem:[#allocation5] ss:$8 sps:$4 sm:$0xff]   ;;  %v1838_v63 = vld [vmem:[#allocation5 + $0x4] ss:$8 sps:$4 sm:$0xff]   ;;  %v1841_v0 = vld [vmem:[#allocation5 + $0x14] ss:$8 sps:$4 sm:$0xff]  }
  0x3b   :  { %200 = vmatprep.mubr.bf16.mxu0 %v2128_v1  ;;  %1198 = vmatprep.subr.bf16.mxu0 %v1838_v63  ;;  %v1844_v2 = vld [vmem:[#allocation5 + $0x24] ss:$8 sps:$4 sm:$0xff]   ;;  %v1842_v3 = vld [vmem:[#allocation5 + $0x20] ss:$8 sps:$4 sm:$0xff]   ;;  %v1847_v4 = vld [vmem:[#allocation5 + $0x34] ss:$8 sps:$4 sm:$0xff]  }
  0x3c   :  { %1199 = vmatpush1.bf16.msra.mxu0 %v1836_v62  ;;  %v1845_v5 = vld [vmem:[#allocation5 + $0x30] ss:$8 sps:$4 sm:$0xff]   ;;  %v1850_v6 = vld [vmem:[#allocation5 + $0x44] ss:$8 sps:$4 sm:$0xff]   ;;  %v1848_v7 = vld [vmem:[#allocation5 + $0x40] ss:$8 sps:$4 sm:$0xff]  }
  0x3d   :  { %682 = vmatpush1.bf16.msra.mxu1 %v1802_v23  ;;  %1200 = vmatprep.subr.bf16.mxu0 %v1841_v0  ;;  %v1853_v8 = vld [vmem:[#allocation5 + $0x54] ss:$8 sps:$4 sm:$0xff]   ;;  %v1851_v9 = vld [vmem:[#allocation5 + $0x50] ss:$8 sps:$4 sm:$0xff]   ;;  %v1856_v10 = vld [vmem:[#allocation5 + $0x64] ss:$8 sps:$4 sm:$0xff]  }
  0x3e   :  { %683 = vmatprep.subr.bf16.mxu1 %v1803_v25  ;;  %v1854_v11 = vld [vmem:[#allocation5 + $0x60] ss:$8 sps:$4 sm:$0xff]   ;;  %v1859_v12 = vld [vmem:[#allocation5 + $0x74] ss:$8 sps:$4 sm:$0xff]   ;;  %v1857_v13 = vld [vmem:[#allocation5 + $0x70] ss:$8 sps:$4 sm:$0xff]  }
  0x3f   :  { %v1862_v14 = vld [vmem:[#allocation5 + $0x84] ss:$8 sps:$4 sm:$0xff]   ;;  %v1860_v16 = vld [vmem:[#allocation5 + $0x80] ss:$8 sps:$4 sm:$0xff]   ;;  %v1865_v17 = vld [vmem:[#allocation5 + $0x94] ss:$8 sps:$4 sm:$0xff]  }
  0x40   :  { %v2284_v18 = vshrl.u32 %v93_v15, 7  ;;  %v1863_v19 = vld [vmem:[#allocation5 + $0x90] ss:$8 sps:$4 sm:$0xff]   ;;  %v91_v21 = vld [vmem:[%s2918_s2] sm:$0x3] }
  0x41   :  { %684 = vmatpush1.bf16.msra.mxu1 %v1805_v28 }
  0x42   :  { %1608 = vmatmul.mubr.msk.bf16.gmra.mrb[8].mxu0 %vm123_vm0, %v81_v24  ;;  %685 = vmatprep.subr.bf16.mxu1 %v1806_v29  ;;  %v2287_v20 = vsub.s32 0, %v2284_v18  ;;  %v2293_v22 = vsub.s32 1, %v2284_v18 }
  0x43   :  { %210 = vmatprep.mubr.bf16.mxu0 %v2128_v1 }
  0x44   :  { %v2296_v23 = vrot.slane %v91_v21, %v2287_v20  ;;  %v2299_v24 = vrot.slane %v91_v21, %v2293_v22 }
  0x45   :  { %686 = vmatpush1.bf16.msra.mxu1 %v1808_v30 }
  0x46   :  { %687 = vmatprep.subr.bf16.mxu1 %v1809_v32 }
  0x49   :  { %688 = vmatpush1.bf16.msra.mxu1 %v1811_v35 }
  0x4a   :  { %1609 = vmatmul.mubr.msk.bf16.gmra.mrb[12].mxu0 %vm123_vm0, %v82_v31  ;;  %689 = vmatprep.subr.bf16.mxu1 %v1812_v36 }
  0x4b   :  { %220 = vmatprep.mubr.bf16.mxu0 %v2128_v1 }
  0x4d   :  { %690 = vmatpush1.bf16.msra.mxu1 %v1814_v38 }
  0x4e   :  { %691 = vmatprep.subr.bf16.mxu1 %v1815_v39 }
  0x51   :  { %692 = vmatpush1.bf16.msra.mxu1 %v1817_v49 }
  0x52   :  { %1610 = vmatmul.mubr.msk.bf16.gmra.mrb[16].mxu0 %vm123_vm0, %v83_v37  ;;  %693 = vmatprep.subr.bf16.mxu1 %v1818_v50 }
  0x53   :  { %230 = vmatprep.mubr.bf16.mxu0 %v2128_v1 }
  0x55   :  { %694 = vmatpush1.bf16.msra.mxu1 %v1820_v51 }
  0x56   :  { %695 = vmatprep.subr.bf16.mxu1 %v1821_v52 }
  0x59   :  { %696 = vmatpush1.bf16.msra.mxu1 %v1823_v53 }
  0x5a   :  { %1611 = vmatmul.mubr.msk.bf16.gmra.mrb[20].mxu0 %vm123_vm0, %v84_v42  ;;  %697 = vmatprep.subr.bf16.mxu1 %v1824_v54 }
  0x5b   :  { %240 = vmatprep.mubr.bf16.mxu0 %v2128_v1 }
  0x5d   :  { %698 = vmatpush1.bf16.msra.mxu1 %v1826_v55 }
  0x5e   :  { %699 = vmatprep.subr.bf16.mxu1 %v1827_v56 }
  0x61   :  { %700 = vmatpush1.bf16.msra.mxu1 %v1829_v57 }
  0x62   :  { %1612 = vmatmul.mubr.msk.bf16.gmra.mrb[24].mxu0 %vm123_vm0, %v85_v45  ;;  %701 = vmatprep.subr.bf16.mxu1 %v1830_v58 }
  0x63   :  { %250 = vmatprep.mubr.bf16.mxu0 %v2128_v1  ;;  %v1839_v1 = vld [vmem:[#allocation5 + $0x10] ss:$8 sps:$4 sm:$0xff]  }
  0x64   :  { %1201 = vmatpush1.bf16.msra.mxu0 %v1839_v1 }
  0x65   :  { %702 = vmatpush1.bf16.msra.mxu1 %v1832_v59  ;;  %1202 = vmatprep.subr.bf16.mxu0 %v1844_v2 }
  0x66   :  { %703 = vmatprep.subr.bf16.mxu1 %v1833_v60 }
  0x68   :  { %1203 = vmatpush1.bf16.msra.mxu0 %v1842_v3 }
  0x69   :  { %704 = vmatpush1.bf16.msra.mxu1 %v1835_v61  ;;  %1204 = vmatprep.subr.bf16.mxu0 %v1847_v4 }
  0x6a   :  { %1613 = vmatmul.mubr.msk.bf16.gmra.mrb[28].mxu0 %vm123_vm0, %v86_v48 }
  0x6c   :  { %1205 = vmatpush1.bf16.msra.mxu0 %v1845_v5 }
  0x6d   :  { %1206 = vmatprep.subr.bf16.mxu0 %v1850_v6 }
  0x70   :  { %1207 = vmatpush1.bf16.msra.mxu0 %v1848_v7 }
  0x71   :  { %1208 = vmatprep.subr.bf16.mxu0 %v1853_v8 }
  0x74   :  { %1209 = vmatpush1.bf16.msra.mxu0 %v1851_v9 }
  0x75   :  { %1210 = vmatprep.subr.bf16.mxu0 %v1856_v10 }
  0x78   :  { %1211 = vmatpush1.bf16.msra.mxu0 %v1854_v11 }
  0x79   :  { %1212 = vmatprep.subr.bf16.mxu0 %v1859_v12 }
  0x7c   :  { %1213 = vmatpush1.bf16.msra.mxu0 %v1857_v13 }
  0x7d   :  { %1214 = vmatprep.subr.bf16.mxu0 %v1862_v14 }
  0x80   :  { %1215 = vmatpush1.bf16.msra.mxu0 %v1860_v16 }
  0x81   :  { %1216 = vmatprep.subr.bf16.mxu0 %v1865_v17 }
  0x84   :  { %1217 = vmatpush1.bf16.msra.mxu0 %v1863_v19 }
 0x105   :  { %v182_v25 = vpop.f32.mrb[0].mxu0 }
 0x106   :  { %v2302_v26 = vadd.f32 %v182_v25, %v2296_v23  ;;  %v184_v27 = vpop.f32.mrb[1].mxu0 }
 0x107   :  { %v2305_v28 = vadd.f32 %v184_v27, %v2299_v24  ;;  %v186_v29 = vpop.f32.mrb[2].mxu0 }
 0x108   :  { %v261_v30 = vmin.f32 %v2302_v26, 0.0  ;;  %v2309_v31 = vadd.f32 %v186_v29, %v2296_v23  ;;  %v188_v32 = vpop.f32.mrb[3].mxu0  ;;  %vm389_vm1 = vcmp.gt.f32.partialorder %v2302_v26, 0.0 }
 0x109   :  { %v262_v33 = vmin.f32 %v2305_v28, 0.0  ;;  %v189_v34 = vadd.f32 %v188_v32, %v2299_v24  ;;  %vm390_vm2 = vcmp.gt.f32.partialorder %v2305_v28, 0.0 }
 0x10a   :  { %v293_v35 = vmul.f32 1.442695, %v261_v30  ;;  %v263_v36 = vmin.f32 %v2309_v31, 0.0  ;;  %vm391_vm3 = vcmp.gt.f32.partialorder %v2309_v31, 0.0 }
 0x10b   :  { %v295_v37 = vmul.f32 1.442695, %v262_v33  ;;  %v264_v38 = vmin.f32 %v189_v34, 0.0  ;;  %vm392_vm4 = vcmp.gt.f32.partialorder %v189_v34, 0.0 }
 0x10c   :  { %1884 = vpow2.f32 %v293_v35  ;;  %v297_v39 = vmul.f32 1.442695, %v263_v36 }
 0x10d   :  { %1886 = vpow2.f32 %v295_v37  ;;  %v299_v40 = vmul.f32 1.442695, %v264_v38  ;;  %v192_v41 = vpop.f32.mrb[4].mxu0 }
 0x10e   :  { %1888 = vpow2.f32 %v297_v39  ;;  %v2315_v42 = vadd.f32 %v192_v41, %v2296_v23  ;;  %v194_v43 = vpop.f32.mrb[5].mxu0 }
 0x10f   :  { %1890 = vpow2.f32 %v299_v40  ;;  %v2318_v44 = vadd.f32 %v194_v43, %v2299_v24  ;;  %v196_v45 = vpop.f32.mrb[6].mxu0 }
 0x110   :  { %v265_v46 = vmin.f32 %v2315_v42, 0.0  ;;  %v2322_v47 = vadd.f32 %v196_v45, %v2296_v23  ;;  %v198_v48 = vpop.f32.mrb[7].mxu0  ;;  %vm393_vm5 = vcmp.gt.f32.partialorder %v2315_v42, 0.0 }
 0x111   :  { %v266_v49 = vmin.f32 %v2318_v44, 0.0  ;;  %v2326_v50 = vadd.f32 %v198_v48, %v2299_v24  ;;  %vm394_vm6 = vcmp.gt.f32.partialorder %v2318_v44, 0.0 }
 0x112   :  { %v301_v51 = vmul.f32 1.442695, %v265_v46  ;;  %v267_v52 = vmin.f32 %v2322_v47, 0.0  ;;  %vm395_vm7 = vcmp.gt.f32.partialorder %v2322_v47, 0.0 }
 0x113   :  { %v303_v53 = vmul.f32 1.442695, %v266_v49  ;;  %v268_v54 = vmin.f32 %v2326_v50, 0.0  ;;  %vm396_vm8 = vcmp.gt.f32.partialorder %v2326_v50, 0.0 }
 0x114   :  { %1892 = vpow2.f32 %v301_v51  ;;  %v305_v55 = vmul.f32 1.442695, %v267_v52 }
 0x115   :  { %1894 = vpow2.f32 %v303_v53  ;;  %v307_v56 = vmul.f32 1.442695, %v268_v54  ;;  %v202_v57 = vpop.f32.mrb[8].mxu0 }
 0x116   :  { %v1885_v58 = vpop.eup %1884  ;;  %1896 = vpow2.f32 %v305_v55  ;;  %v2331_v59 = vadd.f32 %v202_v57, %v2296_v23  ;;  %v204_v60 = vpop.f32.mrb[9].mxu0 }
 0x117   :  { %v1887_v61 = vpop.eup %1886  ;;  %1898 = vpow2.f32 %v307_v56  ;;  %v2335_v62 = vadd.f32 %v204_v60, %v2299_v24  ;;  %v206_v63 = vpop.f32.mrb[10].mxu0  ;;  %v1614_v1 = vadd.f32 -1.0, %v1885_v58 }
 0x118   :  { %v1889_v0 = vpop.eup %1888  ;;  %v269_v2 = vmin.f32 %v2331_v59, 0.0  ;;  %v2339_v3 = vadd.f32 %v206_v63, %v2296_v23  ;;  %v208_v4 = vpop.f32.mrb[11].mxu0  ;;  %v1615_v5 = vadd.f32 -1.0, %v1887_v61  ;;  %vm397_vm9 = vcmp.gt.f32.partialorder %v2331_v59, 0.0 }
 0x119   :  { %v1891_v6 = vpop.eup %1890  ;;  %v1616_v7 = vadd.f32 -1.0, %v1889_v0  ;;  %v270_v8 = vmin.f32 %v2335_v62, 0.0  ;;  %v2343_v9 = vadd.f32 %v208_v4, %v2299_v24  ;;  %v421_v19 = vsel %vm389_vm1, %v2302_v26, %v1614_v1 }
 0x11a   :  { %v309_v10 = vmul.f32 1.442695, %v269_v2  ;;  %v271_v11 = vmin.f32 %v2339_v3, 0.0  ;;  %v1617_v12 = vadd.f32 -1.0, %v1891_v6  ;;  %v422_v15 = vsel %vm390_vm2, %v2305_v28, %v1615_v5 }
 0x11b   :  { %v311_v13 = vmul.f32 1.442695, %v270_v8  ;;  %v272_v14 = vmin.f32 %v2343_v9, 0.0  ;;  %v423_v29 = vsel %vm391_vm3, %v2309_v31, %v1616_v7  ;;  %vm398_vm10 = vcmp.gt.f32.partialorder %v2335_v62, 0.0 }
 0x11c   :  { %1900 = vpow2.f32 %v309_v10  ;;  %v313_v16 = vmul.f32 1.442695, %v271_v11  ;;  %v424_v17 = vsel %vm392_vm4, %v189_v34, %v1617_v12  ;;  %v453_v33 = vpack.c.bf16 %v423_v29, %v421_v19 }
 0x11d   :  { %1902 = vpow2.f32 %v311_v13  ;;  %v315_v21 = vmul.f32 1.442695, %v272_v14  ;;  %v212_v25 = vpop.f32.mrb[12].mxu0  ;;  %v454_v27 = vpack.c.bf16 %v424_v17, %v422_v15  ;;  %vm399_vm11 = vcmp.gt.f32.partialorder %v2339_v3, 0.0 }
 0x11e   :  { %v1893_v30 = vpop.eup %1892  ;;  %1904 = vpow2.f32 %v313_v16  ;;  %v2357_v32 = vadd.f32 %v212_v25, %v2296_v23  ;;  %v214_v28 = vpop.f32.mrb[13].mxu0  ;;  %vm400_vm12 = vcmp.gt.f32.partialorder %v2343_v9, 0.0 }
 0x11f   :  { %v1895_v34 = vpop.eup %1894  ;;  %1906 = vpow2.f32 %v315_v21  ;;  %v2361_v26 = vadd.f32 %v214_v28, %v2299_v24  ;;  %v216_v35 = vpop.f32.mrb[14].mxu0  ;;  %705 = vmatprep.mubr.bf16.mxu1 %v454_v27  ;;  %v1618_v37 = vadd.f32 -1.0, %v1893_v30 }
 0x120   :  { %v1897_v36 = vpop.eup %1896  ;;  %v1619_v38 = vadd.f32 -1.0, %v1895_v34  ;;  %v273_v31 = vmin.f32 %v2357_v32, 0.0  ;;  %v2365_v39 = vadd.f32 %v216_v35, %v2296_v23  ;;  %v218_v40 = vpop.f32.mrb[15].mxu0  ;;  %706 = vmatmul.mubr.bf16.vlgmr.msra.gmra.mrb[0].mxu1 %v453_v33  ;;  %vm401_vm13 = vcmp.gt.f32.partialorder %v2357_v32, 0.0 }
 0x121   :  { %v1899_v41 = vpop.eup %1898  ;;  %v1620_v43 = vadd.f32 -1.0, %v1897_v36  ;;  %v274_v45 = vmin.f32 %v2361_v26, 0.0  ;;  %v2370_v46 = vadd.f32 %v218_v40, %v2299_v24  ;;  %v425_v57 = vsel %vm393_vm5, %v2315_v42, %v1618_v37 }
 0x122   :  { %v1621_v48 = vadd.f32 -1.0, %v1899_v41  ;;  %v317_v49 = vmul.f32 1.442695, %v273_v31  ;;  %v275_v51 = vmin.f32 %v2365_v39, 0.0  ;;  %v426_v54 = vsel %vm394_vm6, %v2318_v44, %v1619_v38 }
 0x123   :  { %v319_v52 = vmul.f32 1.442695, %v274_v45  ;;  %v276_v53 = vmin.f32 %v2370_v46, 0.0  ;;  %v427_v63 = vsel %vm395_vm7, %v2322_v47, %v1620_v43  ;;  %vm402_vm14 = vcmp.gt.f32.partialorder %v2361_v26, 0.0 }
 0x124   :  { %1908 = vpow2.f32 %v317_v49  ;;  %v321_v55 = vmul.f32 1.442695, %v275_v51  ;;  %v428_v56 = vsel %vm396_vm8, %v2326_v50, %v1621_v48  ;;  %v455_v2 = vpack.c.bf16 %v427_v63, %v425_v57 }
 0x125   :  { %1910 = vpow2.f32 %v319_v52  ;;  %v323_v58 = vmul.f32 1.442695, %v276_v53  ;;  %v222_v60 = vpop.f32.mrb[16].mxu0  ;;  %v456_v61 = vpack.c.bf16 %v428_v56, %v426_v54  ;;  %vm403_vm15 = vcmp.gt.f32.partialorder %v2365_v39, 0.0 }
 0x126   :  { %v1901_v0 = vpop.eup %1900  ;;  %1912 = vpow2.f32 %v321_v55  ;;  %v2385_v44 = vadd.f32 %v222_v60, %v2296_v23  ;;  %v224_v1 = vpop.f32.mrb[17].mxu0  ;;  %vm404_vm0 = vcmp.gt.f32.partialorder %v2370_v46, 0.0 }
 0x127   :  { %v1903_v50 = vpop.eup %1902  ;;  %1914 = vpow2.f32 %v323_v58  ;;  %v2389_v42 = vadd.f32 %v224_v1, %v2299_v24  ;;  %v226_v4 = vpop.f32.mrb[18].mxu0  ;;  %715 = vmatprep.mubr.bf16.mxu1 %v456_v61  ;;  %v1622_v6 = vadd.f32 -1.0, %v1901_v0 }
 0x128   :  { %v1905_v5 = vpop.eup %1904  ;;  %v1623_v7 = vadd.f32 -1.0, %v1903_v50  ;;  %v277_v47 = vmin.f32 %v2385_v44, 0.0  ;;  %v2393_v8 = vadd.f32 %v226_v4, %v2296_v23  ;;  %v228_v10 = vpop.f32.mrb[19].mxu0  ;;  %716 = vmatmul.mubr.bf16.gmra.mrb[4].mxu1 %v455_v2  ;;  %vm405_vm1 = vcmp.gt.f32.partialorder %v2385_v44, 0.0 }
 0x129   :  { %v1907_v11 = vpop.eup %1906  ;;  %v1624_v12 = vadd.f32 -1.0, %v1905_v5  ;;  %v278_v13 = vmin.f32 %v2389_v42, 0.0  ;;  %v2398_v14 = vadd.f32 %v228_v10, %v2299_v24  ;;  %v429_v30 = vsel %vm397_vm9, %v2331_v59, %v1622_v6 }
 0x12a   :  { %v1625_v15 = vadd.f32 -1.0, %v1907_v11  ;;  %v325_v16 = vmul.f32 1.442695, %v277_v47  ;;  %v279_v17 = vmin.f32 %v2393_v8, 0.0  ;;  %v430_v25 = vsel %vm398_vm10, %v2335_v62, %v1623_v7 }
 0x12b   :  { %v327_v19 = vmul.f32 1.442695, %v278_v13  ;;  %v280_v21 = vmin.f32 %v2398_v14, 0.0  ;;  %v431_v35 = vsel %vm399_vm11, %v2339_v3, %v1624_v12  ;;  %vm406_vm2 = vcmp.gt.f32.partialorder %v2389_v42, 0.0 }
 0x12c   :  { %1916 = vpow2.f32 %v325_v16  ;;  %v329_v27 = vmul.f32 1.442695, %v279_v17  ;;  %v432_v29 = vsel %vm400_vm12, %v2343_v9, %v1625_v15  ;;  %v457_v38 = vpack.c.bf16 %v431_v35, %v429_v30 }
 0x12d   :  { %1918 = vpow2.f32 %v327_v19  ;;  %v331_v28 = vmul.f32 1.442695, %v280_v21  ;;  %v232_v33 = vpop.f32.mrb[20].mxu0  ;;  %v458_v34 = vpack.c.bf16 %v432_v29, %v430_v25  ;;  %vm407_vm3 = vcmp.gt.f32.partialorder %v2393_v8, 0.0 }
 0x12e   :  { %v1909_v36 = vpop.eup %1908  ;;  %1920 = vpow2.f32 %v329_v27  ;;  %v2413_v62 = vadd.f32 %v232_v33, %v2296_v23  ;;  %v234_v37 = vpop.f32.mrb[21].mxu0  ;;  %vm408_vm4 = vcmp.gt.f32.partialorder %v2398_v14, 0.0 }
 0x12f   :  { %v1911_v9 = vpop.eup %1910  ;;  %1922 = vpow2.f32 %v331_v28  ;;  %v2417_v59 = vadd.f32 %v234_v37, %v2299_v24  ;;  %v236_v31 = vpop.f32.mrb[22].mxu0  ;;  %725 = vmatprep.mubr.bf16.mxu1 %v458_v34  ;;  %v1626_v41 = vadd.f32 -1.0, %v1909_v36 }
 0x130   :  { %v1913_v40 = vpop.eup %1912  ;;  %v1627_v43 = vadd.f32 -1.0, %v1911_v9  ;;  %v281_v3 = vmin.f32 %v2413_v62, 0.0  ;;  %v2421_v45 = vadd.f32 %v236_v31, %v2296_v23  ;;  %v238_v48 = vpop.f32.mrb[23].mxu0  ;;  %726 = vmatmul.mubr.bf16.gmra.mrb[8].mxu1 %v457_v38  ;;  %vm409_vm5 = vcmp.gt.f32.partialorder %v2413_v62, 0.0 }
 0x131   :  { %v1915_v49 = vpop.eup %1914  ;;  %v1628_v51 = vadd.f32 -1.0, %v1913_v40  ;;  %v282_v52 = vmin.f32 %v2417_v59, 0.0  ;;  %v2426_v53 = vadd.f32 %v238_v48, %v2299_v24  ;;  %v433_v0 = vsel %vm401_vm13, %v2357_v32, %v1626_v41 }
 0x132   :  { %v1629_v54 = vadd.f32 -1.0, %v1915_v49  ;;  %v333_v55 = vmul.f32 1.442695, %v281_v3  ;;  %v283_v56 = vmin.f32 %v2421_v45, 0.0  ;;  %v434_v60 = vsel %vm402_vm14, %v2361_v26, %v1627_v43 }
 0x133   :  { %v335_v57 = vmul.f32 1.442695, %v282_v52  ;;  %v284_v58 = vmin.f32 %v2426_v53, 0.0  ;;  %v435_v4 = vsel %vm403_vm15, %v2365_v39, %v1628_v51  ;;  %vm410_vm6 = vcmp.gt.f32.partialorder %v2417_v59, 0.0 }
 0x134   :  { %1924 = vpow2.f32 %v333_v55  ;;  %v337_v61 = vmul.f32 1.442695, %v283_v56  ;;  %v436_v63 = vsel %vm404_vm0, %v2370_v46, %v1629_v54  ;;  %v459_v7 = vpack.c.bf16 %v435_v4, %v433_v0 }
 0x135   :  { %1926 = vpow2.f32 %v335_v57  ;;  %v339_v1 = vmul.f32 1.442695, %v284_v58  ;;  %v242_v2 = vpop.f32.mrb[24].mxu0  ;;  %v460_v50 = vpack.c.bf16 %v436_v63, %v434_v60  ;;  %vm411_vm7 = vcmp.gt.f32.partialorder %v2421_v45, 0.0 }
 0x136   :  { %v1917_v5 = vpop.eup %1916  ;;  %1928 = vpow2.f32 %v337_v61  ;;  %v2441_v26 = vadd.f32 %v242_v2, %v2296_v23  ;;  %v244_v6 = vpop.f32.mrb[25].mxu0  ;;  %vm412_vm8 = vcmp.gt.f32.partialorder %v2426_v53, 0.0 }
 0x137   :  { %v1919_v46 = vpop.eup %1918  ;;  %1930 = vpow2.f32 %v339_v1  ;;  %v2445_v32 = vadd.f32 %v244_v6, %v2299_v24  ;;  %v246_v47 = vpop.f32.mrb[26].mxu0  ;;  %735 = vmatprep.mubr.bf16.mxu1 %v460_v50  ;;  %v1630_v11 = vadd.f32 -1.0, %v1917_v5 }
 0x138   :  { %v1921_v10 = vpop.eup %1920  ;;  %v1631_v12 = vadd.f32 -1.0, %v1919_v46  ;;  %v285_v39 = vmin.f32 %v2441_v26, 0.0  ;;  %v2449_v13 = vadd.f32 %v246_v47, %v2296_v23  ;;  %v248_v15 = vpop.f32.mrb[27].mxu0  ;;  %736 = vmatmul.mubr.bf16.gmra.mrb[12].mxu1 %v459_v7  ;;  %vm413_vm9 = vcmp.gt.f32.partialorder %v2441_v26, 0.0 }
 0x139   :  { %v1923_v16 = vpop.eup %1922  ;;  %v1632_v17 = vadd.f32 -1.0, %v1921_v10  ;;  %v286_v19 = vmin.f32 %v2445_v32, 0.0  ;;  %v2454_v21 = vadd.f32 %v248_v15, %v2299_v24  ;;  %v437_v36 = vsel %vm405_vm1, %v2385_v44, %v1630_v11 }
 0x13a   :  { %v1633_v25 = vadd.f32 -1.0, %v1923_v16  ;;  %v341_v27 = vmul.f32 1.442695, %v285_v39  ;;  %v287_v29 = vmin.f32 %v2449_v13, 0.0  ;;  %v438_v33 = vsel %vm406_vm2, %v2389_v42, %v1631_v12 }
 0x13b   :  { %v343_v30 = vmul.f32 1.442695, %v286_v19  ;;  %v288_v28 = vmin.f32 %v2454_v21, 0.0  ;;  %v439_v31 = vsel %vm407_vm3, %v2393_v8, %v1632_v17  ;;  %vm415_vm10 = vcmp.gt.f32.partialorder %v2449_v13, 0.0 }
 0x13c   :  { %1932 = vpow2.f32 %v341_v27  ;;  %v345_v34 = vmul.f32 1.442695, %v287_v29  ;;  %v440_v35 = vsel %vm408_vm4, %v2398_v14, %v1633_v25  ;;  %v461_v43 = vpack.c.bf16 %v439_v31, %v437_v36  ;;  %v1871_v31 = vld [vmem:[#allocation5 + $0xb4] ss:$8 sps:$4 sm:$0xff]  }
 0x13d   :  { %1934 = vpow2.f32 %v343_v30  ;;  %v347_v37 = vmul.f32 1.442695, %v288_v28  ;;  %v252_v38 = vpop.f32.mrb[28].mxu0  ;;  %v462_v9 = vpack.c.bf16 %v440_v35, %v438_v33  ;;  %vm414_vm11 = vcmp.gt.f32.partialorder %v2445_v32, 0.0 }
 0x13e   :  { %v1925_v40 = vpop.eup %1924  ;;  %1936 = vpow2.f32 %v345_v34  ;;  %v2469_v42 = vadd.f32 %v252_v38, %v2296_v23  ;;  %v254_v41 = vpop.f32.mrb[29].mxu0  ;;  %vm416_vm12 = vcmp.gt.f32.partialorder %v2454_v21, 0.0  ;;  %v1868_v38 = vld [vmem:[#allocation5 + $0xa4] ss:$8 sps:$4 sm:$0xff]  }
 0x13f   :  { %v1927_v14 = vpop.eup %1926  ;;  %1938 = vpow2.f32 %v347_v37  ;;  %v2473_v44 = vadd.f32 %v254_v41, %v2299_v24  ;;  %v256_v3 = vpop.f32.mrb[30].mxu0  ;;  %745 = vmatprep.mubr.bf16.mxu1 %v462_v9  ;;  %v1634_v49 = vadd.f32 -1.0, %v1925_v40  ;;  %v1866_v9 = vld [vmem:[#allocation5 + $0xa0] ss:$8 sps:$4 sm:$0xff]   ;;  %1218 = vmatprep.subr.bf16.mxu0 %v1868_v38  ;;  %v1869_v40 = vld [vmem:[#allocation5 + $0xb0] ss:$8 sps:$4 sm:$0xff]  }
 0x140   :  { %v1929_v48 = vpop.eup %1928  ;;  %v1635_v51 = vadd.f32 -1.0, %v1927_v14  ;;  %v289_v8 = vmin.f32 %v2469_v42, 0.0  ;;  %v2477_v52 = vadd.f32 %v256_v3, %v2296_v23  ;;  %v258_v54 = vpop.f32.mrb[31].mxu0  ;;  %746 = vmatmul.mubr.bf16.gmra.mrb[16].mxu1 %v461_v43  ;;  %vm417_vm13 = vcmp.gt.f32.partialorder %v2469_v42, 0.0  ;;  %1219 = vmatpush1.bf16.msra.mxu0 %v1866_v9  ;;  %v1874_v41 = vld [vmem:[#allocation5 + $0xc4] ss:$8 sps:$4 sm:$0xff]  }
 0x141   :  { %v1931_v55 = vpop.eup %1930  ;;  %v1636_v56 = vadd.f32 -1.0, %v1929_v48  ;;  %v290_v57 = vmin.f32 %v2473_v44, 0.0  ;;  %v259_v58 = vadd.f32 %v258_v54, %v2299_v24  ;;  %v441_v24 = vsel %vm409_vm5, %v2413_v62, %v1634_v49  ;;  %1220 = vmatprep.subr.bf16.mxu0 %v1871_v31  ;;  %v1872_v43 = vld [vmem:[#allocation5 + $0xc0] ss:$8 sps:$4 sm:$0xff]   ;;  %v1875_v14 = vld [vmem:[#allocation5 + $0xd0] ss:$8 sps:$4 sm:$0xff]  }
 0x142   :  { %v1637_v60 = vadd.f32 -1.0, %v1931_v55  ;;  %v349_v61 = vmul.f32 1.442695, %v289_v8  ;;  %v291_v63 = vmin.f32 %v2477_v52, 0.0  ;;  %v442_v1 = vsel %vm410_vm6, %v2417_v59, %v1635_v51  ;;  %v1878_v3 = vld [vmem:[#allocation5 + $0xe0] ss:$8 sps:$4 sm:$0xff]  }
 0x143   :  { %v351_v23 = vmul.f32 1.442695, %v290_v57  ;;  %v292_v0 = vmin.f32 %v259_v58, 0.0  ;;  %v443_v6 = vsel %vm411_vm7, %v2421_v45, %v1636_v56  ;;  %vm419_vm14 = vcmp.gt.f32.partialorder %v2477_v52, 0.0  ;;  %v1883_v48 = vld [vmem:[#allocation5 + $0xf4] ss:$8 sps:$4 sm:$0xff]  }
 0x144   :  { %1940 = vpow2.f32 %v349_v61  ;;  %v353_v2 = vmul.f32 1.442695, %v291_v63  ;;  %v444_v50 = vsel %vm412_vm8, %v2426_v53, %v1637_v60  ;;  %v463_v46 = vpack.c.bf16 %v443_v6, %v441_v24  ;;  %1221 = vmatpush1.bf16.msra.mxu0 %v1869_v40  ;;  %v1881_v49 = vld [vmem:[#allocation5 + $0xf0] ss:$8 sps:$4 sm:$0xff]   ;;  %v501_v51 = vld [vmem:[%s2920_s4] sm:$0x3] }
 0x145   :  { %1942 = vpow2.f32 %v351_v23  ;;  %v355_v4 = vmul.f32 1.442695, %v292_v0  ;;  %v464_v5 = vpack.c.bf16 %v444_v50, %v442_v1  ;;  %vm418_vm15 = vcmp.gt.f32.partialorder %v2473_v44, 0.0  ;;  %1222 = vmatprep.subr.bf16.mxu0 %v1874_v41 }
 0x146   :  { %v1933_v7 = vpop.eup %1932  ;;  %1944 = vpow2.f32 %v353_v2  ;;  %vm420_vm0 = vcmp.gt.f32.partialorder %v259_v58, 0.0  ;;  %v2509_v8 = vrot.slane %v501_v51, %v2287_v20 }
 0x147   :  { %v1935_v47 = vpop.eup %1934  ;;  %v1638_v10 = vadd.f32 -1.0, %v1933_v7  ;;  %1946 = vpow2.f32 %v355_v4  ;;  %755 = vmatprep.mubr.bf16.mxu1 %v464_v5 }
 0x148   :  { %v1937_v59 = vpop.eup %1936  ;;  %v1639_v11 = vadd.f32 -1.0, %v1935_v47  ;;  %756 = vmatmul.mubr.bf16.gmra.mrb[20].mxu1 %v463_v46  ;;  %1223 = vmatpush1.bf16.msra.mxu0 %v1872_v43 }
 0x149   :  { %v1939_v53 = vpop.eup %1938  ;;  %v1640_v12 = vadd.f32 -1.0, %v1937_v59  ;;  %v445_v45 = vsel %vm413_vm9, %v2441_v26, %v1638_v10 }
 0x14a   :  { %v1641_v62 = vadd.f32 -1.0, %v1939_v53  ;;  %v446_v15 = vsel %vm414_vm11, %v2445_v32, %v1639_v11 }
 0x14b   :  { %v447_v39 = vsel %vm415_vm10, %v2449_v13, %v1640_v12 }
 0x14c   :  { %v448_v16 = vsel %vm416_vm12, %v2454_v21, %v1641_v62  ;;  %v465_v17 = vpack.c.bf16 %v447_v39, %v445_v45 }
 0x14d   :  { %v466_v19 = vpack.c.bf16 %v448_v16, %v446_v15 }
 0x14e   :  { %v1941_v25 = vpop.eup %1940 }
 0x14f   :  { %v1943_v27 = vpop.eup %1942  ;;  %v1642_v29 = vadd.f32 -1.0, %v1941_v25  ;;  %765 = vmatprep.mubr.bf16.mxu1 %v466_v19 }
 0x150   :  { %v1945_v30 = vpop.eup %1944  ;;  %v1643_v28 = vadd.f32 -1.0, %v1943_v27  ;;  %766 = vmatmul.mubr.bf16.gmra.mrb[24].mxu1 %v465_v17 }
 0x151   :  { %v1947_v33 = vpop.eup %1946  ;;  %v1644_v34 = vadd.f32 -1.0, %v1945_v30  ;;  %v449_v32 = vsel %vm417_vm13, %v2469_v42, %v1642_v29  ;;  %v1877_v42 = vld [vmem:[#allocation5 + $0xd4] ss:$8 sps:$4 sm:$0xff]  }
 0x152   :  { %v1645_v26 = vadd.f32 -1.0, %v1947_v33  ;;  %v450_v21 = vsel %vm418_vm15, %v2473_v44, %v1643_v28  ;;  %1224 = vmatprep.subr.bf16.mxu0 %v1877_v42  ;;  %v1880_v44 = vld [vmem:[#allocation5 + $0xe4] ss:$8 sps:$4 sm:$0xff]  }
 0x153   :  { %v451_v13 = vsel %vm419_vm14, %v2477_v52, %v1644_v34  ;;  %1225 = vmatpush1.bf16.msra.mxu0 %v1875_v14  ;;  %v2512_v52 = vrot.slane %v501_v51, %v2293_v22 }
 0x154   :  { %v452_v35 = vsel %vm420_vm0, %v259_v58, %v1645_v26  ;;  %v467_v36 = vpack.c.bf16 %v451_v13, %v449_v32  ;;  %1226 = vmatprep.subr.bf16.mxu0 %v1880_v44 }
 0x155   :  { %v468_v37 = vpack.c.bf16 %v452_v35, %v450_v21 }
 0x157   :  { %775 = vmatprep.mubr.bf16.mxu1 %v468_v37  ;;  %1227 = vmatpush1.bf16.msra.mxu0 %v1878_v3 }
 0x158   :  { %776 = vmatmul.mubr.bf16.gmra.mrb[28].mxu1 %v467_v36  ;;  %1228 = vmatprep.subr.bf16.mxu0 %v1883_v48 }
 0x15b   :  { %1229 = vmatpush1.bf16.msra.mxu0 %v1881_v49 }
 0x1f3   :  { %v707_v54 = vpop.f32.mrb[0].mxu1 }
 0x1f4   :  { %v708_v55 = vadd.f32 %v707_v54, %v2509_v8  ;;  %v709_v56 = vpop.f32.mrb[1].mxu1 }
 0x1f5   :  { %v2516_v57 = vadd.f32 %v709_v56, %v2512_v52  ;;  %v711_v58 = vpop.f32.mrb[2].mxu1 }
 0x1f6   :  { %v786_v60 = vmin.f32 %v708_v55, 0.0  ;;  %v712_v61 = vadd.f32 %v711_v58, %v2509_v8  ;;  %v713_v63 = vpop.f32.mrb[3].mxu1  ;;  %vm914_vm1 = vcmp.gt.f32.partialorder %v708_v55, 0.0 }
 0x1f7   :  { %v787_v23 = vmin.f32 %v2516_v57, 0.0  ;;  %v2521_v0 = vadd.f32 %v713_v63, %v2512_v52  ;;  %vm915_vm2 = vcmp.gt.f32.partialorder %v2516_v57, 0.0 }
 0x1f8   :  { %v818_v1 = vmul.f32 1.442695, %v786_v60  ;;  %v788_v2 = vmin.f32 %v712_v61, 0.0  ;;  %vm916_vm3 = vcmp.gt.f32.partialorder %v712_v61, 0.0 }
 0x1f9   :  { %v820_v50 = vmul.f32 1.442695, %v787_v23  ;;  %v789_v24 = vmin.f32 %v2521_v0, 0.0  ;;  %vm917_vm4 = vcmp.gt.f32.partialorder %v2521_v0, 0.0 }
 0x1fa   :  { %1948 = vpow2.f32 %v818_v1  ;;  %v822_v4 = vmul.f32 1.442695, %v788_v2 }
 0x1fb   :  { %1950 = vpow2.f32 %v820_v50  ;;  %v824_v5 = vmul.f32 1.442695, %v789_v24  ;;  %v717_v6 = vpop.f32.mrb[4].mxu1 }
 0x1fc   :  { %1952 = vpow2.f32 %v822_v4  ;;  %v2525_v7 = vadd.f32 %v717_v6, %v2509_v8  ;;  %v719_v46 = vpop.f32.mrb[5].mxu1 }
 0x1fd   :  { %1954 = vpow2.f32 %v824_v5  ;;  %v2528_v47 = vadd.f32 %v719_v46, %v2512_v52  ;;  %v721_v10 = vpop.f32.mrb[6].mxu1 }
 0x1fe   :  { %v790_v59 = vmin.f32 %v2525_v7, 0.0  ;;  %v2532_v11 = vadd.f32 %v721_v10, %v2509_v8  ;;  %v723_v53 = vpop.f32.mrb[7].mxu1  ;;  %vm918_vm5 = vcmp.gt.f32.partialorder %v2525_v7, 0.0 }
 0x1ff   :  { %v791_v12 = vmin.f32 %v2528_v47, 0.0  ;;  %v2536_v62 = vadd.f32 %v723_v53, %v2512_v52  ;;  %vm919_vm6 = vcmp.gt.f32.partialorder %v2528_v47, 0.0 }
 0x200   :  { %v826_v45 = vmul.f32 1.442695, %v790_v59  ;;  %v792_v39 = vmin.f32 %v2532_v11, 0.0  ;;  %vm920_vm7 = vcmp.gt.f32.partialorder %v2532_v11, 0.0 }
 0x201   :  { %v828_v15 = vmul.f32 1.442695, %v791_v12  ;;  %v793_v16 = vmin.f32 %v2536_v62, 0.0  ;;  %vm921_vm8 = vcmp.gt.f32.partialorder %v2536_v62, 0.0 }
 0x202   :  { %1956 = vpow2.f32 %v826_v45  ;;  %v830_v17 = vmul.f32 1.442695, %v792_v39 }
 0x203   :  { %1958 = vpow2.f32 %v828_v15  ;;  %v832_v19 = vmul.f32 1.442695, %v793_v16  ;;  %v727_v25 = vpop.f32.mrb[8].mxu1 }
 0x204   :  { %v1949_v27 = vpop.eup %1948  ;;  %1960 = vpow2.f32 %v830_v17  ;;  %v2541_v29 = vadd.f32 %v727_v25, %v2509_v8  ;;  %v729_v30 = vpop.f32.mrb[9].mxu1 }
 0x205   :  { %v1951_v28 = vpop.eup %1950  ;;  %v1678_v33 = vadd.f32 -1.0, %v1949_v27  ;;  %1962 = vpow2.f32 %v832_v19  ;;  %v2544_v34 = vadd.f32 %v729_v30, %v2512_v52  ;;  %v731_v26 = vpop.f32.mrb[10].mxu1 }
 0x206   :  { %v1953_v32 = vpop.eup %1952  ;;  %v1679_v13 = vadd.f32 -1.0, %v1951_v28  ;;  %v794_v21 = vmin.f32 %v2541_v29, 0.0  ;;  %v2549_v35 = vadd.f32 %v731_v26, %v2509_v8  ;;  %v733_v36 = vpop.f32.mrb[11].mxu1  ;;  %vm922_vm9 = vcmp.gt.f32.partialorder %v2541_v29, 0.0 }
 0x207   :  { %v1955_v37 = vpop.eup %1954  ;;  %v1680_v38 = vadd.f32 -1.0, %v1953_v32  ;;  %v795_v9 = vmin.f32 %v2544_v34, 0.0  ;;  %v946_v31 = vsel %vm914_vm1, %v708_v55, %v1678_v33  ;;  %v2555_v44 = vadd.f32 %v733_v36, %v2512_v52 }
 0x208   :  { %v1681_v40 = vadd.f32 -1.0, %v1955_v37  ;;  %v834_v41 = vmul.f32 1.442695, %v794_v21  ;;  %v796_v43 = vmin.f32 %v2549_v35, 0.0  ;;  %v947_v3 = vsel %vm915_vm2, %v2516_v57, %v1679_v13 }
 0x209   :  { %v948_v42 = vsel %vm916_vm3, %v712_v61, %v1680_v38  ;;  %v836_v14 = vmul.f32 1.442695, %v795_v9  ;;  %v797_v54 = vmin.f32 %v2555_v44, 0.0  ;;  %vm924_vm10 = vcmp.gt.f32.partialorder %v2549_v35, 0.0 }
 0x20a   :  { %v978_v48 = vpack.c.bf16 %v948_v42, %v946_v31  ;;  %1964 = vpow2.f32 %v834_v41  ;;  %v838_v49 = vmul.f32 1.442695, %v796_v43  ;;  %v949_v51 = vsel %vm917_vm4, %v2521_v0, %v1681_v40 }
 0x20b   :  { %1966 = vpow2.f32 %v836_v14  ;;  %v737_v55 = vpop.f32.mrb[12].mxu1  ;;  %v979_v56 = vpack.c.bf16 %v949_v51, %v947_v3  ;;  %v840_v57 = vmul.f32 1.442695, %v797_v54  ;;  %vm923_vm11 = vcmp.gt.f32.partialorder %v2544_v34, 0.0 }
 0x20c   :  { %v1957_v58 = vpop.eup %1956  ;;  %1968 = vpow2.f32 %v838_v49  ;;  %v2563_v60 = vadd.f32 %v737_v55, %v2509_v8  ;;  %v739_v61 = vpop.f32.mrb[13].mxu1  ;;  %vm925_vm12 = vcmp.gt.f32.partialorder %v2555_v44, 0.0 }
 0x20d   :  { %v1959_v63 = vpop.eup %1958  ;;  %v2567_v23 = vadd.f32 %v739_v61, %v2512_v52  ;;  %v741_v1 = vpop.f32.mrb[14].mxu1  ;;  %1230 = vmatprep.mubr.bf16.mxu0 %v979_v56  ;;  %v1682_v6 = vadd.f32 -1.0, %v1957_v58  ;;  %1970 = vpow2.f32 %v840_v57 }
 0x20e   :  { %v1961_v0 = vpop.eup %1960  ;;  %v1683_v2 = vadd.f32 -1.0, %v1959_v63  ;;  %v798_v50 = vmin.f32 %v2563_v60, 0.0  ;;  %v2572_v24 = vadd.f32 %v741_v1, %v2509_v8  ;;  %v743_v4 = vpop.f32.mrb[15].mxu1  ;;  %1231 = vmatmul.mubr.bf16.vlgmr.msra.gmra.mrb[32].mxu0 %v978_v48  ;;  %vm926_vm13 = vcmp.gt.f32.partialorder %v2563_v60, 0.0 }
 0x20f   :  { %v1963_v5 = vpop.eup %1962  ;;  %v1684_v46 = vadd.f32 -1.0, %v1961_v0  ;;  %v799_v10 = vmin.f32 %v2567_v23, 0.0  ;;  %v2579_v39 = vadd.f32 %v743_v4, %v2512_v52  ;;  %v950_v28 = vsel %vm918_vm5, %v2525_v7, %v1682_v6 }
 0x210   :  { %v1685_v59 = vadd.f32 -1.0, %v1963_v5  ;;  %v842_v53 = vmul.f32 1.442695, %v798_v50  ;;  %v800_v12 = vmin.f32 %v2572_v24, 0.0  ;;  %v951_v15 = vsel %vm919_vm6, %v2528_v47, %v1683_v2 }
 0x211   :  { %v844_v45 = vmul.f32 1.442695, %v799_v10  ;;  %v952_v19 = vsel %vm920_vm7, %v2532_v11, %v1684_v46  ;;  %v801_v25 = vmin.f32 %v2579_v39, 0.0  ;;  %vm928_vm14 = vcmp.gt.f32.partialorder %v2572_v24, 0.0 }
 0x212   :  { %1972 = vpow2.f32 %v842_v53  ;;  %v846_v16 = vmul.f32 1.442695, %v800_v12  ;;  %v953_v17 = vsel %vm921_vm8, %v2536_v62, %v1685_v59  ;;  %v980_v32 = vpack.c.bf16 %v952_v19, %v950_v28 }
 0x213   :  { %1974 = vpow2.f32 %v844_v45  ;;  %v747_v27 = vpop.f32.mrb[16].mxu1  ;;  %v981_v30 = vpack.c.bf16 %v953_v17, %v951_v15  ;;  %v848_v21 = vmul.f32 1.442695, %v801_v25  ;;  %vm927_vm15 = vcmp.gt.f32.partialorder %v2567_v23, 0.0 }
 0x214   :  { %v1965_v33 = vpop.eup %1964  ;;  %1976 = vpow2.f32 %v846_v16  ;;  %v2591_v26 = vadd.f32 %v747_v27, %v2509_v8  ;;  %v749_v47 = vpop.f32.mrb[17].mxu1  ;;  %vm929_vm0 = vcmp.gt.f32.partialorder %v2579_v39, 0.0 }
 0x215   :  { %v1967_v13 = vpop.eup %1966  ;;  %v1686_v62 = vadd.f32 -1.0, %v1965_v33  ;;  %v2594_v11 = vadd.f32 %v749_v47, %v2512_v52  ;;  %v751_v36 = vpop.f32.mrb[18].mxu1  ;;  %1240 = vmatprep.mubr.bf16.mxu0 %v981_v30  ;;  %1978 = vpow2.f32 %v848_v21 }
 0x216   :  { %v1969_v37 = vpop.eup %1968  ;;  %v802_v7 = vmin.f32 %v2591_v26, 0.0  ;;  %v2599_v38 = vadd.f32 %v751_v36, %v2509_v8  ;;  %v753_v9 = vpop.f32.mrb[19].mxu1  ;;  %1241 = vmatmul.mubr.bf16.gmra.mrb[36].mxu0 %v980_v32  ;;  %v1687_v31 = vadd.f32 -1.0, %v1967_v13  ;;  %vm930_vm1 = vcmp.gt.f32.partialorder %v2591_v26, 0.0 }
 0x217   :  { %v1688_v40 = vadd.f32 -1.0, %v1969_v37  ;;  %v803_v41 = vmin.f32 %v2594_v11, 0.0  ;;  %v2605_v14 = vadd.f32 %v753_v9, %v2512_v52  ;;  %v1971_v3 = vpop.eup %1970  ;;  %v954_v49 = vsel %vm922_vm9, %v2541_v29, %v1686_v62 }
 0x218   :  { %v850_v43 = vmul.f32 1.442695, %v802_v7  ;;  %v804_v42 = vmin.f32 %v2599_v38, 0.0  ;;  %v1689_v54 = vadd.f32 -1.0, %v1971_v3  ;;  %v955_v61 = vsel %vm923_vm11, %v2544_v34, %v1687_v31 }
 0x219   :  { %v852_v48 = vmul.f32 1.442695, %v803_v41  ;;  %v956_v51 = vsel %vm924_vm10, %v2549_v35, %v1688_v40  ;;  %v805_v56 = vmin.f32 %v2605_v14, 0.0  ;;  %vm931_vm2 = vcmp.gt.f32.partialorder %v2594_v11, 0.0 }
 0x21a   :  { %1980 = vpow2.f32 %v850_v43  ;;  %v854_v55 = vmul.f32 1.442695, %v804_v42  ;;  %v982_v63 = vpack.c.bf16 %v956_v51, %v954_v49  ;;  %v957_v35 = vsel %vm925_vm12, %v2555_v44, %v1689_v54 }
 0x21b   :  { %1982 = vpow2.f32 %v852_v48  ;;  %v757_v58 = vpop.f32.mrb[20].mxu1  ;;  %v856_v1 = vmul.f32 1.442695, %v805_v56  ;;  %v983_v5 = vpack.c.bf16 %v957_v35, %v955_v61  ;;  %vm932_vm3 = vcmp.gt.f32.partialorder %v2599_v38, 0.0 }
 0x21c   :  { %v1973_v57 = vpop.eup %1972  ;;  %1984 = vpow2.f32 %v854_v55  ;;  %v2616_v0 = vadd.f32 %v757_v58, %v2509_v8  ;;  %v759_v29 = vpop.f32.mrb[21].mxu1  ;;  %vm933_vm4 = vcmp.gt.f32.partialorder %v2605_v14, 0.0 }
 0x21d   :  { %v1975_v2 = vpop.eup %1974  ;;  %v2620_v50 = vadd.f32 %v759_v29, %v2512_v52  ;;  %v761_v4 = vpop.f32.mrb[22].mxu1  ;;  %v1690_v46 = vadd.f32 -1.0, %v1973_v57  ;;  %1986 = vpow2.f32 %v856_v1  ;;  %1250 = vmatprep.mubr.bf16.mxu0 %v983_v5 }
 0x21e   :  { %v1977_v6 = vpop.eup %1976  ;;  %v806_v34 = vmin.f32 %v2616_v0, 0.0  ;;  %v763_v10 = vpop.f32.mrb[23].mxu1  ;;  %v2626_v12 = vadd.f32 %v761_v4, %v2509_v8  ;;  %v1691_v44 = vadd.f32 -1.0, %v1975_v2  ;;  %1251 = vmatmul.mubr.bf16.gmra.mrb[40].mxu0 %v982_v63  ;;  %vm934_vm5 = vcmp.gt.f32.partialorder %v2616_v0, 0.0 }
 0x21f   :  { %v1692_v59 = vadd.f32 -1.0, %v1977_v6  ;;  %v807_v53 = vmin.f32 %v2620_v50, 0.0  ;;  %v2630_v15 = vadd.f32 %v763_v10, %v2512_v52  ;;  %v1979_v16 = vpop.eup %1978  ;;  %v958_v28 = vsel %vm926_vm13, %v2563_v60, %v1690_v46 }
 0x220   :  { %v858_v45 = vmul.f32 1.442695, %v806_v34  ;;  %v808_v19 = vmin.f32 %v2626_v12, 0.0  ;;  %v1693_v27 = vadd.f32 -1.0, %v1979_v16  ;;  %v959_v36 = vsel %vm927_vm15, %v2567_v23, %v1691_v44 }
 0x221   :  { %v860_v17 = vmul.f32 1.442695, %v807_v53  ;;  %v960_v25 = vsel %vm928_vm14, %v2572_v24, %v1692_v59  ;;  %v809_v30 = vmin.f32 %v2630_v15, 0.0  ;;  %vm935_vm6 = vcmp.gt.f32.partialorder %v2620_v50, 0.0 }
 0x222   :  { %1988 = vpow2.f32 %v858_v45  ;;  %v862_v33 = vmul.f32 1.442695, %v808_v19  ;;  %v984_v32 = vpack.c.bf16 %v960_v25, %v958_v28  ;;  %v961_v37 = vsel %vm929_vm0, %v2579_v39, %v1693_v27 }
 0x223   :  { %1990 = vpow2.f32 %v860_v17  ;;  %v767_v47 = vpop.f32.mrb[24].mxu1  ;;  %v864_v62 = vmul.f32 1.442695, %v809_v30  ;;  %v985_v31 = vpack.c.bf16 %v961_v37, %v959_v36  ;;  %vm936_vm7 = vcmp.gt.f32.partialorder %v2626_v12, 0.0 }
 0x224   :  { %v1981_v13 = vpop.eup %1980  ;;  %v2641_v21 = vadd.f32 %v767_v47, %v2509_v8  ;;  %v769_v24 = vpop.f32.mrb[25].mxu1  ;;  %1992 = vpow2.f32 %v862_v33  ;;  %vm937_vm8 = vcmp.gt.f32.partialorder %v2630_v15, 0.0 }
 0x225   :  { %v1983_v7 = vpop.eup %1982  ;;  %v2649_v60 = vadd.f32 %v769_v24, %v2512_v52  ;;  %v771_v9 = vpop.f32.mrb[26].mxu1  ;;  %v1694_v41 = vadd.f32 -1.0, %v1981_v13  ;;  %1994 = vpow2.f32 %v864_v62  ;;  %1260 = vmatprep.mubr.bf16.mxu0 %v985_v31 }
 0x226   :  { %v1985_v40 = vpop.eup %1984  ;;  %v1695_v43 = vadd.f32 -1.0, %v1983_v7  ;;  %v810_v42 = vmin.f32 %v2641_v21, 0.0  ;;  %v773_v3 = vpop.f32.mrb[27].mxu1  ;;  %v2655_v48 = vadd.f32 %v771_v9, %v2509_v8  ;;  %1261 = vmatmul.mubr.bf16.gmra.mrb[44].mxu0 %v984_v32  ;;  %vm938_vm9 = vcmp.gt.f32.partialorder %v2641_v21, 0.0 }
 0x227   :  { %v1696_v23 = vadd.f32 -1.0, %v1985_v40  ;;  %v811_v39 = vmin.f32 %v2649_v60, 0.0  ;;  %v1987_v49 = vpop.eup %1986  ;;  %v2660_v54 = vadd.f32 %v773_v3, %v2512_v52  ;;  %v962_v57 = vsel %vm930_vm1, %v2591_v26, %v1694_v41 }
 0x228   :  { %v866_v51 = vmul.f32 1.442695, %v810_v42  ;;  %v1697_v55 = vadd.f32 -1.0, %v1987_v49  ;;  %v812_v58 = vmin.f32 %v2655_v48, 0.0  ;;  %v963_v61 = vsel %vm931_vm2, %v2594_v11, %v1695_v43 }
 0x229   :  { %v868_v56 = vmul.f32 1.442695, %v811_v39  ;;  %v813_v63 = vmin.f32 %v2660_v54, 0.0  ;;  %v964_v1 = vsel %vm932_vm3, %v2599_v38, %v1696_v23  ;;  %vm940_vm10 = vcmp.gt.f32.partialorder %v2655_v48, 0.0 }
 0x22a   :  { %1996 = vpow2.f32 %v866_v51  ;;  %v870_v29 = vmul.f32 1.442695, %v812_v58  ;;  %v965_v2 = vsel %vm933_vm4, %v2605_v14, %v1697_v55  ;;  %v986_v4 = vpack.c.bf16 %v964_v1, %v962_v57 }
 0x22b   :  { %1998 = vpow2.f32 %v868_v56  ;;  %v777_v35 = vpop.f32.mrb[28].mxu1  ;;  %v872_v6 = vmul.f32 1.442695, %v813_v63  ;;  %v987_v34 = vpack.c.bf16 %v965_v2, %v963_v61  ;;  %vm939_vm11 = vcmp.gt.f32.partialorder %v2649_v60, 0.0 }
 0x22c   :  { %v1989_v5 = vpop.eup %1988  ;;  %v2671_v46 = vadd.f32 %v777_v35, %v2509_v8  ;;  %v779_v11 = vpop.f32.mrb[29].mxu1  ;;  %2000 = vpow2.f32 %v870_v29  ;;  %vm941_vm12 = vcmp.gt.f32.partialorder %v2660_v54, 0.0  ;;  %v2129_v2 = vmov 1966171168  }
 0x22d   :  { %v1991_v10 = vpop.eup %1990  ;;  %v2675_v26 = vadd.f32 %v779_v11, %v2512_v52  ;;  %v781_v38 = vpop.f32.mrb[30].mxu1  ;;  %v1698_v59 = vadd.f32 -1.0, %v1989_v5  ;;  %2002 = vpow2.f32 %v872_v6  ;;  %1270 = vmatprep.mubr.bf16.mxu0 %v987_v34  ;;  %v2705_v5 = vld.sshfl [vmem:[%s2923_s7] sm:$0x11 pattern:$0x75316420] }
 0x22e   :  { %v1699_v53 = vadd.f32 -1.0, %v1991_v10  ;;  %v814_v14 = vmin.f32 %v2671_v46, 0.0  ;;  %v783_v44 = vpop.f32.mrb[31].mxu1  ;;  %v1993_v45 = vpop.eup %1992  ;;  %v782_v17 = vadd.f32 %v781_v38, %v2509_v8  ;;  %1271 = vmatmul.mubr.bf16.gmra.mrb[48].mxu0 %v986_v4  ;;  %vm942_vm13 = vcmp.gt.f32.partialorder %v2671_v46, 0.0  ;;  %v1026_v38 = vld [vmem:[%s2922_s6] sm:$0x3] }
 0x22f   :  { %v815_v16 = vmin.f32 %v2675_v26, 0.0  ;;  %v784_v19 = vadd.f32 %v783_v44, %v2512_v52  ;;  %v1995_v25 = vpop.eup %1994  ;;  %v1700_v27 = vadd.f32 -1.0, %v1993_v45  ;;  %v966_v8 = vsel %vm934_vm5, %v2616_v0, %v1698_v59 }
 0x230   :  { %v874_v30 = vmul.f32 1.442695, %v814_v14  ;;  %v1701_v28 = vadd.f32 -1.0, %v1995_v25  ;;  %v816_v47 = vmin.f32 %v782_v17, 0.0  ;;  %v967_v32 = vsel %vm935_vm6, %v2620_v50, %v1699_v53 }
 0x231   :  { %v876_v33 = vmul.f32 1.442695, %v815_v16  ;;  %v817_v13 = vmin.f32 %v784_v19, 0.0  ;;  %v968_v52 = vsel %vm936_vm7, %v2626_v12, %v1700_v27  ;;  %vm944_vm14 = vcmp.gt.f32.partialorder %v782_v17, 0.0 }
 0x232   :  { %2004 = vpow2.f32 %v874_v30  ;;  %v878_v62 = vmul.f32 1.442695, %v816_v47  ;;  %v969_v24 = vsel %vm937_vm8, %v2630_v15, %v1701_v28  ;;  %v988_v36 = vpack.c.bf16 %v968_v52, %v966_v8 }
 0x233   :  { %2006 = vpow2.f32 %v876_v33  ;;  %v880_v7 = vmul.f32 1.442695, %v817_v13  ;;  %v989_v9 = vpack.c.bf16 %v969_v24, %v967_v32  ;;  %vm943_vm15 = vcmp.gt.f32.partialorder %v2675_v26, 0.0 }
 0x234   :  { %v1997_v37 = vpop.eup %1996  ;;  %2008 = vpow2.f32 %v878_v62  ;;  %vm945_vm0 = vcmp.gt.f32.partialorder %v784_v19, 0.0  ;;  %v1540_v4 = vunpack.c.l.s4 %v2129_v2  ;;  %v1538_v11 = vcombine.high %v2705_v5, %v2705_v5 }
 0x235   :  { %v1999_v31 = vpop.eup %1998  ;;  %v1702_v40 = vadd.f32 -1.0, %v1997_v37  ;;  %2010 = vpow2.f32 %v880_v7  ;;  %1280 = vmatprep.mubr.bf16.mxu0 %v989_v9  ;;  %v2719_v59 = vrot.slane %v1026_v38, %v2287_v20  ;;  %v2722_v53 = vrot.slane %v1026_v38, %v2293_v22 }
 0x236   :  { %v2001_v50 = vpop.eup %2000  ;;  %v1703_v41 = vadd.f32 -1.0, %v1999_v31  ;;  %1281 = vmatmul.mubr.bf16.gmra.mrb[52].mxu0 %v988_v36  ;;  %v1541_v6 = vunpack.c.0.s8 %v1540_v4 }
 0x237   :  { %v2003_v43 = vpop.eup %2002  ;;  %v1704_v42 = vadd.f32 -1.0, %v2001_v50  ;;  %v970_v12 = vsel %vm938_vm9, %v2641_v21, %v1702_v40 }
 0x238   :  { %v1705_v0 = vadd.f32 -1.0, %v2003_v43  ;;  %v971_v3 = vsel %vm939_vm11, %v2649_v60, %v1703_v41 }
 0x239   :  { %v972_v15 = vsel %vm940_vm10, %v2655_v48, %v1704_v42 }
 0x23a   :  { %v973_v23 = vsel %vm941_vm12, %v2660_v54, %v1705_v0  ;;  %v990_v39 = vpack.c.bf16 %v972_v15, %v970_v12 }
 0x23b   :  { %v991_v51 = vpack.c.bf16 %v973_v23, %v971_v3 }
 0x23c   :  { %v2005_v49 = vpop.eup %2004 }
 0x23d   :  { %v2007_v55 = vpop.eup %2006  ;;  %v1706_v56 = vadd.f32 -1.0, %v2005_v49  ;;  %1290 = vmatprep.mubr.bf16.mxu0 %v991_v51 }
 0x23e   :  { %v2009_v58 = vpop.eup %2008  ;;  %v1707_v61 = vadd.f32 -1.0, %v2007_v55  ;;  %1291 = vmatmul.mubr.bf16.gmra.mrb[56].mxu0 %v990_v39 }
 0x23f   :  { %v2011_v63 = vpop.eup %2010  ;;  %v1708_v57 = vadd.f32 -1.0, %v2009_v58  ;;  %v974_v60 = vsel %vm942_vm13, %v2671_v46, %v1706_v56  ;;  %v2710_v46 = vsub.s32 %v1541_v6, %v2284_v18 }
 0x240   :  { %v1709_v21 = vadd.f32 -1.0, %v2011_v63  ;;  %v975_v54 = vsel %vm943_vm15, %v2675_v26, %v1707_v61  ;;  %v1520_v26 = vld [vmem:[#allocation2] sm:$0x1] }
 0x241   :  { %v976_v48 = vsel %vm944_vm14, %v782_v17, %v1708_v57  ;;  %v1545_v34 = vrot.slane %v2705_v5, %v2710_v46  ;;  %v1552_v10 = vrot.slane %v1538_v11, %v2710_v46  ;;  %1523 = vperm.xlu0 %1781, %v1520_v26  }
 0x242   :  { %v977_v1 = vsel %vm945_vm0, %v784_v19, %v1709_v21  ;;  %v992_v29 = vpack.c.bf16 %v976_v48, %v974_v60 }
 0x243   :  { %v993_v35 = vpack.c.bf16 %v977_v1, %v975_v54  ;;  %1587 = vmatprep.mubr.bf16.mxu1 %v1552_v10 }
 0x245   :  { %1300 = vmatprep.mubr.bf16.mxu0 %v993_v35 }
 0x246   :  { %1301 = vmatmul.mubr.bf16.gmra.mrb[60].mxu0 %v992_v29 }
 0x2e1   :  { %v1232_v18 = vpop.f32.mrb[32].mxu0 }
 0x2e2   :  { %v1233_v14 = vadd.f32 %v1232_v18, %v2719_v59  ;;  %v1234_v44 = vpop.f32.mrb[33].mxu0 }
 0x2e3   :  { %v2726_v45 = vadd.f32 %v1234_v44, %v2722_v53  ;;  %v1236_v16 = vpop.f32.mrb[34].mxu0 }
 0x2e4   :  { %v1311_v17 = vmin.f32 %v1233_v14, 0.0  ;;  %v1237_v19 = vadd.f32 %v1236_v16, %v2719_v59  ;;  %v1238_v25 = vpop.f32.mrb[35].mxu0  ;;  %vm1439_vm1 = vcmp.gt.f32.partialorder %v1233_v14, 0.0 }
 0x2e5   :  { %v1312_v27 = vmin.f32 %v2726_v45, 0.0  ;;  %v2731_v30 = vadd.f32 %v1238_v25, %v2722_v53  ;;  %vm1440_vm3 = vcmp.gt.f32.partialorder %v2726_v45, 0.0 }
 0x2e6   :  { %v1343_v28 = vmul.f32 1.442695, %v1311_v17  ;;  %v1313_v22 = vmin.f32 %v1237_v19, 0.0  ;;  %vm1441_vm2 = vcmp.gt.f32.partialorder %v1237_v19, 0.0 }
 0x2e7   :  { %v1345_v33 = vmul.f32 1.442695, %v1312_v27  ;;  %v1314_v47 = vmin.f32 %v2731_v30, 0.0  ;;  %vm1442_vm4 = vcmp.gt.f32.partialorder %v2731_v30, 0.0 }
 0x2e8   :  { %2012 = vpow2.f32 %v1343_v28  ;;  %v1347_v32 = vmul.f32 1.442695, %v1313_v22 }
 0x2e9   :  { %2014 = vpow2.f32 %v1345_v33  ;;  %v1349_v13 = vmul.f32 1.442695, %v1314_v47  ;;  %v1242_v8 = vpop.f32.mrb[36].mxu0 }
 0x2ea   :  { %2016 = vpow2.f32 %v1347_v32  ;;  %v2735_v52 = vadd.f32 %v1242_v8, %v2719_v59  ;;  %v1244_v62 = vpop.f32.mrb[37].mxu0 }
 0x2eb   :  { %2018 = vpow2.f32 %v1349_v13  ;;  %v2738_v24 = vadd.f32 %v1244_v62, %v2722_v53  ;;  %v1246_v36 = vpop.f32.mrb[38].mxu0 }
 0x2ec   :  { %v1315_v37 = vmin.f32 %v2735_v52, 0.0  ;;  %v2742_v7 = vadd.f32 %v1246_v36, %v2719_v59  ;;  %v1248_v9 = vpop.f32.mrb[39].mxu0  ;;  %vm1443_vm5 = vcmp.gt.f32.partialorder %v2735_v52, 0.0 }
 0x2ed   :  { %v1316_v31 = vmin.f32 %v2738_v24, 0.0  ;;  %v2746_v40 = vadd.f32 %v1248_v9, %v2722_v53  ;;  %vm1444_vm7 = vcmp.gt.f32.partialorder %v2738_v24, 0.0 }
 0x2ee   :  { %v1351_v50 = vmul.f32 1.442695, %v1315_v37  ;;  %v1317_v41 = vmin.f32 %v2742_v7, 0.0  ;;  %vm1445_vm6 = vcmp.gt.f32.partialorder %v2742_v7, 0.0 }
 0x2ef   :  { %v1353_v43 = vmul.f32 1.442695, %v1316_v31  ;;  %v1318_v42 = vmin.f32 %v2746_v40, 0.0  ;;  %vm1446_vm8 = vcmp.gt.f32.partialorder %v2746_v40, 0.0 }
 0x2f0   :  { %2020 = vpow2.f32 %v1351_v50  ;;  %v1355_v0 = vmul.f32 1.442695, %v1317_v41 }
 0x2f1   :  { %2022 = vpow2.f32 %v1353_v43  ;;  %v1357_v12 = vmul.f32 1.442695, %v1318_v42  ;;  %v1252_v39 = vpop.f32.mrb[40].mxu0 }
 0x2f2   :  { %v2013_v15 = vpop.eup %2012  ;;  %2024 = vpow2.f32 %v1355_v0  ;;  %v2751_v51 = vadd.f32 %v1252_v39, %v2719_v59  ;;  %v1254_v55 = vpop.f32.mrb[41].mxu0 }
 0x2f3   :  { %v2015_v3 = vpop.eup %2014  ;;  %v1742_v23 = vadd.f32 -1.0, %v2013_v15  ;;  %2026 = vpow2.f32 %v1357_v12  ;;  %v2754_v61 = vadd.f32 %v1254_v55, %v2722_v53  ;;  %v1256_v63 = vpop.f32.mrb[42].mxu0 }
 0x2f4   :  { %v2017_v49 = vpop.eup %2016  ;;  %v1743_v57 = vadd.f32 -1.0, %v2015_v3  ;;  %v1319_v60 = vmin.f32 %v2751_v51, 0.0  ;;  %v2758_v48 = vadd.f32 %v1256_v63, %v2719_v59  ;;  %v1258_v54 = vpop.f32.mrb[43].mxu0  ;;  %vm1447_vm9 = vcmp.gt.f32.partialorder %v2751_v51, 0.0 }
 0x2f5   :  { %v2019_v56 = vpop.eup %2018  ;;  %v1744_v58 = vadd.f32 -1.0, %v2017_v49  ;;  %v1471_v1 = vsel %vm1439_vm1, %v1233_v14, %v1742_v23  ;;  %v1320_v35 = vmin.f32 %v2754_v61, 0.0  ;;  %v2762_v2 = vadd.f32 %v1258_v54, %v2722_v53 }
 0x2f6   :  { %v1745_v21 = vadd.f32 -1.0, %v2019_v56  ;;  %v1359_v6 = vmul.f32 1.442695, %v1319_v60  ;;  %v1321_v11 = vmin.f32 %v2758_v48, 0.0  ;;  %v1472_v14 = vsel %vm1440_vm3, %v2726_v45, %v1743_v57 }
 0x2f7   :  { %v1473_v29 = vsel %vm1441_vm2, %v1237_v19, %v1744_v58  ;;  %v1361_v10 = vmul.f32 1.442695, %v1320_v35  ;;  %v1322_v26 = vmin.f32 %v2762_v2, 0.0  ;;  %vm1448_vm10 = vcmp.gt.f32.partialorder %v2754_v61, 0.0 }
 0x2f8   :  { %v1504_v4 = vpack.c.bf16 %v1473_v29, %v1471_v1  ;;  %2028 = vpow2.f32 %v1359_v6  ;;  %v1363_v18 = vmul.f32 1.442695, %v1321_v11  ;;  %v1474_v44 = vsel %vm1442_vm4, %v2731_v30, %v1745_v21 }
 0x2f9   :  { %2030 = vpow2.f32 %v1361_v10  ;;  %v1365_v19 = vmul.f32 1.442695, %v1322_v26  ;;  %v1262_v25 = vpop.f32.mrb[44].mxu0  ;;  %v1505_v27 = vpack.c.bf16 %v1474_v44, %v1472_v14  ;;  %vm1449_vm11 = vcmp.gt.f32.partialorder %v2758_v48, 0.0 }
 0x2fa   :  { %v2021_v38 = vpop.eup %2020  ;;  %2032 = vpow2.f32 %v1363_v18  ;;  %v2772_v22 = vadd.f32 %v1262_v25, %v2719_v59  ;;  %v1264_v33 = vpop.f32.mrb[45].mxu0  ;;  %vm1450_vm12 = vcmp.gt.f32.partialorder %v2762_v2, 0.0 }
 0x2fb   :  { %v2023_v16 = vpop.eup %2022  ;;  %v1746_v17 = vadd.f32 -1.0, %v2021_v38  ;;  %2034 = vpow2.f32 %v1365_v19  ;;  %v2776_v45 = vadd.f32 %v1264_v33, %v2722_v53  ;;  %v1266_v30 = vpop.f32.mrb[46].mxu0  ;;  %1555 = vmatprep.subr.bf16.mxu1 %v1505_v27 }
 0x2fc   :  { %v2025_v28 = vpop.eup %2024  ;;  %v1747_v13 = vadd.f32 -1.0, %v2023_v16  ;;  %v1323_v62 = vmin.f32 %v2772_v22, 0.0  ;;  %v2780_v36 = vadd.f32 %v1266_v30, %v2719_v59  ;;  %v1268_v37 = vpop.f32.mrb[47].mxu0  ;;  %1556 = vmatpush1.bf16.xpose.msra.mxu1 %v1504_v4  ;;  %vm1451_vm13 = vcmp.gt.f32.partialorder %v2772_v22, 0.0 }
 0x2fd   :  { %v2027_v47 = vpop.eup %2026  ;;  %v1748_v32 = vadd.f32 -1.0, %v2025_v28  ;;  %v1475_v9 = vsel %vm1443_vm5, %v2735_v52, %v1746_v17  ;;  %v1324_v50 = vmin.f32 %v2776_v45, 0.0  ;;  %v2788_v41 = vadd.f32 %v1268_v37, %v2722_v53 }
 0x2fe   :  { %v1749_v8 = vadd.f32 -1.0, %v2027_v47  ;;  %v1367_v42 = vmul.f32 1.442695, %v1323_v62  ;;  %v1325_v0 = vmin.f32 %v2780_v36, 0.0  ;;  %vm1452_vm14 = vcmp.gt.f32.partialorder %v2776_v45, 0.0 }
 0x2ff   :  { %v1477_v31 = vsel %vm1445_vm6, %v2742_v7, %v1748_v32  ;;  %v1369_v12 = vmul.f32 1.442695, %v1324_v50  ;;  %v1326_v15 = vmin.f32 %v2788_v41, 0.0  ;;  %v1476_v7 = vsel %vm1444_vm7, %v2738_v24, %v1747_v13 }
 0x300   :  { %v1506_v43 = vpack.c.bf16 %v1477_v31, %v1475_v9  ;;  %2036 = vpow2.f32 %v1367_v42  ;;  %v1371_v52 = vmul.f32 1.442695, %v1325_v0  ;;  %v1478_v3 = vsel %vm1446_vm8, %v2746_v40, %v1749_v8 }
 0x301   :  { %2038 = vpow2.f32 %v1369_v12  ;;  %v1373_v23 = vmul.f32 1.442695, %v1326_v15  ;;  %v1272_v39 = vpop.f32.mrb[48].mxu0  ;;  %v1507_v49 = vpack.c.bf16 %v1478_v3, %v1476_v7  ;;  %vm1453_vm15 = vcmp.gt.f32.partialorder %v2780_v36, 0.0 }
 0x302   :  { %v2029_v55 = vpop.eup %2028  ;;  %2040 = vpow2.f32 %v1371_v52  ;;  %v2797_v56 = vadd.f32 %v1272_v39, %v2719_v59  ;;  %v1274_v58 = vpop.f32.mrb[49].mxu0  ;;  %vm1454_vm0 = vcmp.gt.f32.partialorder %v2788_v41, 0.0 }
 0x303   :  { %v2031_v63 = vpop.eup %2030  ;;  %v1750_v57 = vadd.f32 -1.0, %v2029_v55  ;;  %2042 = vpow2.f32 %v1373_v23  ;;  %v2801_v21 = vadd.f32 %v1274_v58, %v2722_v53  ;;  %v1276_v24 = vpop.f32.mrb[50].mxu0  ;;  %1557 = vmatprep.subr.bf16.mxu1 %v1507_v49 }
 0x304   :  { %v2033_v40 = vpop.eup %2032  ;;  %v1751_v60 = vadd.f32 -1.0, %v2031_v63  ;;  %v1327_v54 = vmin.f32 %v2797_v56, 0.0  ;;  %v2806_v1 = vadd.f32 %v1276_v24, %v2719_v59  ;;  %v1278_v29 = vpop.f32.mrb[51].mxu0  ;;  %1558 = vmatpush1.bf16.xpose.msra.mxu1 %v1506_v43  ;;  %vm1455_vm1 = vcmp.gt.f32.partialorder %v2797_v56, 0.0 }
 0x305   :  { %v2035_v35 = vpop.eup %2034  ;;  %v1752_v4 = vadd.f32 -1.0, %v2033_v40  ;;  %v1328_v6 = vmin.f32 %v2801_v21, 0.0  ;;  %v1479_v11 = vsel %vm1447_vm9, %v2751_v51, %v1750_v57  ;;  %v2817_v44 = vadd.f32 %v1278_v29, %v2722_v53 }
 0x306   :  { %v1753_v10 = vadd.f32 -1.0, %v2035_v35  ;;  %v1375_v26 = vmul.f32 1.442695, %v1327_v54  ;;  %v1329_v38 = vmin.f32 %v2806_v1, 0.0  ;;  %v1480_v16 = vsel %vm1448_vm10, %v2754_v61, %v1751_v60 }
 0x307   :  { %v1481_v18 = vsel %vm1449_vm11, %v2758_v48, %v1752_v4  ;;  %v1377_v14 = vmul.f32 1.442695, %v1328_v6  ;;  %v1330_v51 = vmin.f32 %v2817_v44, 0.0  ;;  %vm1457_vm2 = vcmp.gt.f32.partialorder %v2806_v1, 0.0 }
 0x308   :  { %v1508_v17 = vpack.c.bf16 %v1481_v18, %v1479_v11  ;;  %2044 = vpow2.f32 %v1375_v26  ;;  %v1379_v19 = vmul.f32 1.442695, %v1329_v38  ;;  %v1482_v25 = vsel %vm1450_vm12, %v2762_v2, %v1753_v10 }
 0x309   :  { %2046 = vpow2.f32 %v1377_v14  ;;  %v1282_v27 = vpop.f32.mrb[52].mxu0  ;;  %v1509_v28 = vpack.c.bf16 %v1482_v25, %v1480_v16  ;;  %v1381_v13 = vmul.f32 1.442695, %v1330_v51  ;;  %vm1456_vm3 = vcmp.gt.f32.partialorder %v2801_v21, 0.0 }
 0x30a   :  { %v2037_v33 = vpop.eup %2036  ;;  %2048 = vpow2.f32 %v1379_v19  ;;  %v2825_v48 = vadd.f32 %v1282_v27, %v2719_v59  ;;  %v1284_v47 = vpop.f32.mrb[53].mxu0  ;;  %vm1458_vm4 = vcmp.gt.f32.partialorder %v2817_v44, 0.0 }
 0x30b   :  { %v2039_v32 = vpop.eup %2038  ;;  %v1754_v30 = vadd.f32 -1.0, %v2037_v33  ;;  %v2828_v61 = vadd.f32 %v1284_v47, %v2722_v53  ;;  %v1286_v8 = vpop.f32.mrb[54].mxu0  ;;  %1559 = vmatprep.subr.bf16.mxu1 %v1509_v28  ;;  %2050 = vpow2.f32 %v1381_v13 }
 0x30c   :  { %v2041_v2 = vpop.eup %2040  ;;  %v1331_v62 = vmin.f32 %v2825_v48, 0.0  ;;  %v2834_v37 = vadd.f32 %v1286_v8, %v2719_v59  ;;  %v1288_v9 = vpop.f32.mrb[55].mxu0  ;;  %1560 = vmatpush1.bf16.xpose.msra.mxu1 %v1508_v17  ;;  %v1755_v50 = vadd.f32 -1.0, %v2039_v32  ;;  %vm1459_vm5 = vcmp.gt.f32.partialorder %v2825_v48, 0.0 }
 0x30d   :  { %v2043_v31 = vpop.eup %2042  ;;  %v1756_v43 = vadd.f32 -1.0, %v2041_v2  ;;  %v1332_v42 = vmin.f32 %v2828_v61, 0.0  ;;  %v1483_v52 = vsel %vm1451_vm13, %v2772_v22, %v1754_v30  ;;  %v2842_v23 = vadd.f32 %v1288_v9, %v2722_v53 }
 0x30e   :  { %v1757_v0 = vadd.f32 -1.0, %v2043_v31  ;;  %v1383_v12 = vmul.f32 1.442695, %v1331_v62  ;;  %v1333_v15 = vmin.f32 %v2834_v37, 0.0  ;;  %v1484_v63 = vsel %vm1452_vm14, %v2776_v45, %v1755_v50 }
 0x30f   :  { %v1485_v7 = vsel %vm1453_vm15, %v2780_v36, %v1756_v43  ;;  %v1385_v3 = vmul.f32 1.442695, %v1332_v42  ;;  %v1334_v55 = vmin.f32 %v2842_v23, 0.0  ;;  %vm1461_vm6 = vcmp.gt.f32.partialorder %v2834_v37, 0.0 }
 0x310   :  { %v1510_v39 = vpack.c.bf16 %v1485_v7, %v1483_v52  ;;  %2052 = vpow2.f32 %v1383_v12  ;;  %v1387_v49 = vmul.f32 1.442695, %v1333_v15  ;;  %v1486_v22 = vsel %vm1454_vm0, %v2788_v41, %v1757_v0 }
 0x311   :  { %2054 = vpow2.f32 %v1385_v3  ;;  %v1292_v58 = vpop.f32.mrb[56].mxu0  ;;  %v1511_v40 = vpack.c.bf16 %v1486_v22, %v1484_v63  ;;  %v1389_v29 = vmul.f32 1.442695, %v1334_v55  ;;  %vm1460_vm7 = vcmp.gt.f32.partialorder %v2828_v61, 0.0 }
 0x312   :  { %v2045_v36 = vpop.eup %2044  ;;  %2056 = vpow2.f32 %v1387_v49  ;;  %v2851_v57 = vadd.f32 %v1292_v58, %v2719_v59  ;;  %v1294_v24 = vpop.f32.mrb[57].mxu0  ;;  %vm1462_vm8 = vcmp.gt.f32.partialorder %v2842_v23, 0.0 }
 0x313   :  { %v2047_v60 = vpop.eup %2046  ;;  %v1758_v54 = vadd.f32 -1.0, %v2045_v36  ;;  %v2854_v35 = vadd.f32 %v1294_v24, %v2722_v53  ;;  %v1296_v4 = vpop.f32.mrb[58].mxu0  ;;  %1561 = vmatprep.subr.bf16.mxu1 %v1511_v40  ;;  %2058 = vpow2.f32 %v1389_v29 }
 0x314   :  { %v2049_v6 = vpop.eup %2048  ;;  %v1335_v11 = vmin.f32 %v2851_v57, 0.0  ;;  %v2858_v45 = vadd.f32 %v1296_v4, %v2719_v59  ;;  %v1298_v41 = vpop.f32.mrb[59].mxu0  ;;  %1562 = vmatpush1.bf16.xpose.msra.mxu1 %v1510_v39  ;;  %v1759_v38 = vadd.f32 -1.0, %v2047_v60  ;;  %vm1463_vm9 = vcmp.gt.f32.partialorder %v2851_v57, 0.0 }
 0x315   :  { %v1760_v10 = vadd.f32 -1.0, %v2049_v6  ;;  %v1336_v26 = vmin.f32 %v2854_v35, 0.0  ;;  %v2051_v16 = vpop.eup %2050  ;;  %v1487_v17 = vsel %vm1455_vm1, %v2797_v56, %v1758_v54  ;;  %v2867_v51 = vadd.f32 %v1298_v41, %v2722_v53 }
 0x316   :  { %v1391_v18 = vmul.f32 1.442695, %v1335_v11  ;;  %v1337_v14 = vmin.f32 %v2858_v45, 0.0  ;;  %v1761_v28 = vadd.f32 -1.0, %v2051_v16  ;;  %v1488_v13 = vsel %vm1456_vm3, %v2801_v21, %v1759_v38 }
 0x317   :  { %v1489_v19 = vsel %vm1457_vm2, %v2806_v1, %v1760_v10  ;;  %v1393_v25 = vmul.f32 1.442695, %v1336_v26  ;;  %v1338_v47 = vmin.f32 %v2867_v51, 0.0  ;;  %vm1465_vm10 = vcmp.gt.f32.partialorder %v2858_v45, 0.0 }
 0x318   :  { %v1512_v27 = vpack.c.bf16 %v1489_v19, %v1487_v17  ;;  %2060 = vpow2.f32 %v1391_v18  ;;  %v1395_v33 = vmul.f32 1.442695, %v1337_v14  ;;  %v1490_v8 = vsel %vm1458_vm4, %v2817_v44, %v1761_v28 }
 0x319   :  { %2062 = vpow2.f32 %v1393_v25  ;;  %v1302_v32 = vpop.f32.mrb[60].mxu0  ;;  %v1397_v9 = vmul.f32 1.442695, %v1338_v47  ;;  %v1513_v43 = vpack.c.bf16 %v1490_v8, %v1488_v13  ;;  %vm1464_vm11 = vcmp.gt.f32.partialorder %v2854_v35, 0.0 }
 0x31a   :  { %v2053_v30 = vpop.eup %2052  ;;  %2064 = vpow2.f32 %v1395_v33  ;;  %v2873_v56 = vadd.f32 %v1302_v32, %v2719_v59  ;;  %v1304_v1 = vpop.f32.mrb[61].mxu0  ;;  %vm1466_vm12 = vcmp.gt.f32.partialorder %v2867_v51, 0.0 }
 0x31b   :  { %v2055_v2 = vpop.eup %2054  ;;  %v1762_v62 = vadd.f32 -1.0, %v2053_v30  ;;  %v2878_v31 = vadd.f32 %v1304_v1, %v2722_v53  ;;  %v1306_v50 = vpop.f32.mrb[62].mxu0  ;;  %2066 = vpow2.f32 %v1397_v9  ;;  %1563 = vmatprep.subr.bf16.mxu1 %v1513_v43 }
 0x31c   :  { %v2057_v42 = vpop.eup %2056  ;;  %v1339_v0 = vmin.f32 %v2873_v56, 0.0  ;;  %v2882_v12 = vadd.f32 %v1306_v50, %v2719_v59  ;;  %v1308_v15 = vpop.f32.mrb[63].mxu0  ;;  %v1763_v52 = vadd.f32 -1.0, %v2055_v2  ;;  %1564 = vmatpush1.bf16.xpose.msra.mxu1 %v1512_v27  ;;  %vm1467_vm13 = vcmp.gt.f32.partialorder %v2873_v56, 0.0 }
 0x31d   :  { %v1764_v21 = vadd.f32 -1.0, %v2057_v42  ;;  %v1340_v44 = vmin.f32 %v2878_v31, 0.0  ;;  %v2059_v39 = vpop.eup %2058  ;;  %v1491_v49 = vsel %vm1459_vm5, %v2825_v48, %v1762_v62  ;;  %v1309_v58 = vadd.f32 %v1308_v15, %v2722_v53  ;;  %v1524_v1 = vpop.permute.xlu0 %1523 }
 0x31e   :  { %v1399_v7 = vmul.f32 1.442695, %v1339_v0  ;;  %v1341_v3 = vmin.f32 %v2882_v12, 0.0  ;;  %v1765_v22 = vadd.f32 -1.0, %v2059_v39  ;;  %v1492_v60 = vsel %vm1460_vm7, %v2828_v61, %v1763_v52 }
 0x31f   :  { %v1493_v59 = vsel %vm1461_vm6, %v2834_v37, %v1764_v21  ;;  %v1401_v55 = vmul.f32 1.442695, %v1340_v44  ;;  %v1342_v24 = vmin.f32 %v1309_v58, 0.0  ;;  %vm1469_vm14 = vcmp.gt.f32.partialorder %v2882_v12, 0.0 }
 0x320   :  { %v1514_v63 = vpack.c.bf16 %v1493_v59, %v1491_v49  ;;  %2068 = vpow2.f32 %v1399_v7  ;;  %v1403_v36 = vmul.f32 1.442695, %v1341_v3  ;;  %v1494_v48 = vsel %vm1462_vm8, %v2842_v23, %v1765_v22 }
 0x321   :  { %2070 = vpow2.f32 %v1401_v55  ;;  %v1405_v29 = vmul.f32 1.442695, %v1342_v24  ;;  %v1515_v53 = vpack.c.bf16 %v1494_v48, %v1492_v60  ;;  %vm1468_vm15 = vcmp.gt.f32.partialorder %v2878_v31, 0.0 }
 0x322   :  { %v2061_v40 = vpop.eup %2060  ;;  %2072 = vpow2.f32 %v1403_v36  ;;  %vm1470_vm0 = vcmp.gt.f32.partialorder %v1309_v58, 0.0 }
 0x323   :  { %v2063_v37 = vpop.eup %2062  ;;  %v1766_v54 = vadd.f32 -1.0, %v2061_v40  ;;  %2074 = vpow2.f32 %v1405_v29  ;;  %1565 = vmatprep.subr.bf16.mxu1 %v1515_v53 }
 0x324   :  { %v2065_v4 = vpop.eup %2064  ;;  %v1767_v11 = vadd.f32 -1.0, %v2063_v37  ;;  %1566 = vmatpush1.bf16.xpose.msra.mxu1 %v1514_v63 }
 0x325   :  { %v1768_v6 = vadd.f32 -1.0, %v2065_v4  ;;  %v2067_v41 = vpop.eup %2066  ;;  %v1495_v10 = vsel %vm1463_vm9, %v2851_v57, %v1766_v54 }
 0x326   :  { %v1769_v26 = vadd.f32 -1.0, %v2067_v41  ;;  %v1496_v18 = vsel %vm1464_vm11, %v2854_v35, %v1767_v11 }
 0x327   :  { %v1497_v61 = vsel %vm1465_vm10, %v2858_v45, %v1768_v6 }
 0x328   :  { %v1516_v23 = vpack.c.bf16 %v1497_v61, %v1495_v10  ;;  %v1498_v14 = vsel %vm1466_vm12, %v2867_v51, %v1769_v26 }
 0x329   :  { %v1517_v19 = vpack.c.bf16 %v1498_v14, %v1496_v18 }
 0x32a   :  { %v2069_v38 = vpop.eup %2068 }
 0x32b   :  { %v2071_v16 = vpop.eup %2070  ;;  %v1770_v17 = vadd.f32 -1.0, %v2069_v38  ;;  %1567 = vmatprep.subr.bf16.mxu1 %v1517_v19 }
 0x32c   :  { %v2073_v25 = vpop.eup %2072  ;;  %v1771_v57 = vadd.f32 -1.0, %v2071_v16  ;;  %1568 = vmatpush1.bf16.xpose.msra.mxu1 %v1516_v23 }
 0x32d   :  { %v1772_v27 = vadd.f32 -1.0, %v2073_v25  ;;  %v2075_v45 = vpop.eup %2074  ;;  %v1499_v28 = vsel %vm1467_vm13, %v2873_v56, %v1770_v17  ;;  %v1529_v56 = vrot.slane %v1524_v1, %v2287_v20 }
 0x32e   :  { %v1773_v47 = vadd.f32 -1.0, %v2075_v45  ;;  %v1500_v51 = vsel %vm1468_vm15, %v2878_v31, %v1771_v57 }
 0x32f   :  { %v1501_v33 = vsel %vm1469_vm14, %v2882_v12, %v1772_v27 }
 0x330   :  { %v1518_v35 = vpack.c.bf16 %v1501_v33, %v1499_v28  ;;  %v1502_v32 = vsel %vm1470_vm0, %v1309_v58, %v1773_v47 }
 0x331   :  { %v1519_v30 = vpack.c.bf16 %v1502_v32, %v1500_v51 }
 0x333   :  { %1569 = vmatprep.subr.bf16.mxu1 %v1519_v30 }
 0x334   :  { %1570 = vmatpush1.bf16.xpose.msra.mxu1 %v1518_v35 }
 0x33b   :  { %1588 = vmatmul.mubr.bf16.vlgmr.msra.gmra.mrb[32].mxu1 %v1545_v34 }
 0x40e   :  { %v1589_v13 = vpop.f32.mrb[32].mxu1 }
 0x40f   :  { %v1590_v8 = vadd.f32 %v1589_v13, %v1529_v56  ;;  %v1591_v2 = vpop.f32.mrb[33].mxu1 }
 0x410   :  { %v1592_v62 = vpop.f32.mrb[34].mxu1 }
 0x411   :  { %1595 = vst [vmem:[%s2925_s9] sm:$0x1] %v1590_v8  ;;  %v1593_v9 = vpop.f32.mrb[35].mxu1 }
 0x412   :  { %1600 = vsyncpa [#allocation4], 1 }
 0x413   :  { %1601 = vsyncpa [#allocation6], 1 }

</bundles_post_ra>
